<compile_context>
chip_gen: v6e
topology: v6e:2x2x1
jax: 0.10.0
libtpu: 0.0.40
codegen_flags: <defaults>
</compile_context>

<pallas_src>
import functools

import numpy as np
import jax
import jax.numpy as jnp
from jax.experimental import pallas as pl
from jax.experimental.pallas import tpu as pltpu


def _src_index(p, pad, n_up, up):
    """Map padded/upsampled index p -> source index in the ORIGINAL (pre-upsample) array.

    Implements ReflectionPad2d(pad) on top of nearest Upsample(scale_factor=up).
    Static (shape-only) numpy computation.
    """
    u = p - pad
    u = np.abs(u)
    u = np.where(u > n_up - 1, 2 * (n_up - 1) - u, u)  # single reflection (pad <= n_up - 1)
    return u // up


def _tensorcore_count():
    """Best-effort TensorCore count of the local device (2 on v7x, 1 on v5e/v6e)."""
    try:
        info = pltpu.get_tpu_info()
        for name in ("num_cores", "core_count", "num_tensorcores", "tensorcore_count"):
            v = getattr(info, name, None)
            if isinstance(v, int) and v > 0:
                return v
    except Exception:
        pass
    try:
        d = jax.local_devices()[0]
        for name in ("num_cores", "core_count"):
            v = getattr(d, name, None)
            if isinstance(v, int) and v > 0:
                return v
    except Exception:
        pass
    return 1


def _pick_row_tile(hout, batch, n_cores):
    """Row-tile height.

    Split rows only when the batch grid axis alone cannot feed all TensorCores (v7x @ N=1);
    otherwise use a single tile: fewer grid steps (~0.35 us fixed overhead each) and no
    redundant re-DMA of the constant selection/weight blocks.
    """
    if n_cores <= 1 or batch >= n_cores:
        return hout
    for th in (32, 16, 8):
        if hout % th == 0 and hout // th >= n_cores:
            return th
    return hout


def _upsample_conv_kernel(x_ref, r_ref, m_ref, o_ref, *, K, TH, CW1, LANES, stride):
    # x_ref: (1, H, CW1)        input image, lanes = ci*W + w, last lane == 1.0 (bias carrier)
    # r_ref: (1, r_rows, H)     0/1 row-selection (upsample + reflect) for this row tile
    # m_ref: (K, CW1, LANES)    folded (col-select x conv-weight [+bias row]) matrices, per kh
    # o_ref: (1, TH, LANES)     lane-dense output tile, lanes = co*Wout + x
    hi = jax.lax.Precision.HIGHEST

    # Fused upsample + reflection-pad along H for ALL input channels at once (gather-as-matmul).
    xr = jnp.dot(r_ref[0], x_ref[0], preferred_element_type=jnp.float32,
                 precision=hi)                                   # (r_rows, CW1)

    acc = jnp.zeros((TH, LANES), jnp.float32)
    for kh in range(K):
        # One lane-dense MXU matmul per kh: col-select + W-stride + conv weights (+bias @ kh=0).
        slab = jnp.dot(xr, m_ref[kh], preferred_element_type=jnp.float32,
                       precision=hi)                             # (r_rows, LANES)
        # Output row th uses slab row kh + th*stride (contiguous sublane slice when stride==1).
        tap = jax.lax.slice(slab, (kh, 0),
                            (kh + (TH - 1) * stride + 1, LANES), (stride, 1))  # (TH, LANES)
        acc = acc + tap

    o_ref[0] = acc.astype(o_ref.dtype)


def upsample_conv_layer(x_nchw, weight_oihw, bias, *, kernel_size, stride, upsample=None):
    """Forward pass of UpsampleConvLayer.

    x_nchw:      (N, Cin, H, W)      float32
    weight_oihw: (Cout, Cin, K, K)   float32   (PyTorch Conv2d weight layout)
    bias:        (Cout,)             float32
    returns:     (N, Cout, Hout, Wout) float32
    """
    K = kernel_size
    N, Cin, H, W = x_nchw.shape
    Cout = weight_oihw.shape[0]

    up = upsample if upsample else 1
    Hup, Wup = H * up, W * up
    pad = K // 2
    # _src_index assumes a single reflection (ReflectionPad2d requires pad < dim anyway).
    assert pad <= Hup - 1 and pad <= Wup - 1, "reflection pad larger than upsampled image"
    Hpad, Wpad = Hup + 2 * pad, Wup + 2 * pad
    Hout = (Hpad - K) // stride + 1
    Wout = (Wpad - K) // stride + 1

    TH = _pick_row_tile(Hout, N, _tensorcore_count())
    n_tiles = Hout // TH
    r_rows = (TH - 1) * stride + K

    CW = Cin * W
    CW1 = CW + 1                 # +1 ones column that carries the bias through the matmul
    LANES = Cout * Wout          # lane-dense output width (256 here -> unmasked stores)

    # ---- static (shape-only) selection matrices: upsample + reflection-pad as 0/1 gathers ----
    rowsrc = _src_index(np.arange(Hpad), pad, Hup, up)   # padded row -> original row
    colsrc = _src_index(np.arange(Wpad), pad, Wup, up)   # padded col -> original col

    r3 = np.zeros((n_tiles, r_rows, H), np.float32)      # per row-tile row-selection
    for t in range(n_tiles):
        base = t * TH * stride
        r3[t, np.arange(r_rows), rowsrc[base:base + r_rows]] = 1.0

    cm = np.zeros((K, W, Wout), np.float32)              # per-kw column selection (stride folded)
    for kw in range(K):
        cm[kw, colsrc[np.arange(Wout) * stride + kw], np.arange(Wout)] = 1.0

    # ---- fold conv weights (+bias) into per-kh combined matrices M[kh]: (CW1, Cout*Wout) ----
    # M[kh][ci*W + w, co*Wout + x] = sum_kw cm[kw][w, x] * weight[co, ci, kh, kw]
    m_main = jnp.einsum("kwx,oihk->hiwox", jnp.asarray(cm), weight_oihw.astype(jnp.float32))
    m_main = m_main.reshape(K, CW, LANES)
    bias_row = jnp.repeat(bias.astype(jnp.float32), Wout).reshape(1, 1, LANES)
    extra = jnp.concatenate(
        [bias_row, jnp.zeros((K - 1, 1, LANES), jnp.float32)], axis=0)      # bias only at kh=0
    m_all = jnp.concatenate([m_main, extra], axis=1)                        # (K, CW1, LANES)

    # ---- pack Cin into lanes: (N, Cin, H, W) -> (N, H, Cin*W), append ones column for bias ----
    x_packed = jnp.transpose(x_nchw, (0, 2, 1, 3)).reshape(N, H, CW)
    x_packed = jnp.concatenate(
        [x_packed, jnp.ones((N, H, 1), x_packed.dtype)], axis=-1)           # (N, H, CW1)

    kernel = functools.partial(
        _upsample_conv_kernel, K=K, TH=TH, CW1=CW1, LANES=LANES, stride=stride
    )

    # TODO(synk): band the x input along H (per-tile source-row window via index_map) before
    # scaling to production resolutions on v7x (64 MiB VMEM); at these shapes the image is ~4 KiB.
    out_packed = pl.pallas_call(
        kernel,
        out_shape=jax.ShapeDtypeStruct((N, Hout, LANES), x_nchw.dtype),
        grid=(N, n_tiles),   # keep N outer / t inner: x block index constant in t => no re-DMA
        in_specs=[
            pl.BlockSpec((1, H, CW1), lambda b, t: (b, 0, 0)),
            pl.BlockSpec((1, r_rows, H), lambda b, t: (t, 0, 0)),
            pl.BlockSpec((K, CW1, LANES), lambda b, t: (0, 0, 0)),
        ],
        out_specs=pl.BlockSpec((1, TH, LANES), lambda b, t: (b, t, 0)),
        compiler_params=pltpu.CompilerParams(
            dimension_semantics=("parallel", "parallel")
        ),
    )(x_packed, jnp.asarray(r3), m_all)

    # Free reshape (same memory order) + small output transpose back to NCHW to match the
    # PyTorch module's layout.  (Keep the packed (N, Hout, Cout*Wout) layout across layers
    # instead if the consumer allows it.)
    out = out_packed.reshape(N, Hout, Cout, Wout).transpose(0, 2, 1, 3)
    return out


if __name__ == "__main__":
    # Module config: UpsampleConvLayer(in_channels=4, out_channels=8,
    #                                  kernel_size=3, stride=1, upsample=2)
    in_channels, out_channels, kernel_size, stride, upsample = 4, 8, 3, 1, 2

    key = jax.random.PRNGKey(0)
    kx, kw, kb = jax.random.split(key, 3)

    x = jax.random.normal(kx, (2, in_channels, 16, 16), dtype=jnp.float32)
    weight = jax.random.normal(
        kw, (out_channels, in_channels, kernel_size, kernel_size), dtype=jnp.float32
    ) * 0.1
    bias = jax.random.normal(kb, (out_channels,), dtype=jnp.float32) * 0.1

    out = upsample_conv_layer(
        x, weight, bias, kernel_size=kernel_size, stride=stride, upsample=upsample
    )
    out = jax.block_until_ready(out)

    # Cross-check against XLA's conv on the upsampled + reflection-padded input.
    x_up = jnp.repeat(jnp.repeat(x, upsample, axis=2), upsample, axis=3)
    pad = kernel_size // 2
    x_pad = jnp.pad(x_up, ((0, 0), (0, 0), (pad, pad), (pad, pad)), mode="reflect")
    ref = jax.lax.conv_general_dilated(
        x_pad, weight, window_strides=(stride, stride), padding="VALID",
        dimension_numbers=("NCHW", "OIHW", "NCHW"),
        precision=jax.lax.Precision.HIGHEST,
    ) + bias.reshape(1, -1, 1, 1)
    assert out.shape == ref.shape, (out.shape, ref.shape)
    assert jnp.allclose(out, ref, atol=1e-4, rtol=1e-4), float(jnp.max(jnp.abs(out - ref)))

    print("KERNEL_OK")
</pallas_src>

<mosaic_0001>
module attributes {stable_mosaic.version = 11 : i64} {
  func.func @_upsample_conv_kernel(%arg0: i32, %arg1: i32, %arg2: memref<1x16x65xf32, #tpu.memory_space<vmem>>, %arg3: memref<1x34x16xf32, #tpu.memory_space<vmem>>, %arg4: memref<3x65x256xf32, #tpu.memory_space<vmem>>, %arg5: memref<1x32x256xf32, #tpu.memory_space<vmem>>) attributes {dimension_semantics = [#tpu.dimension_semantics<parallel>, #tpu.dimension_semantics<parallel>], iteration_bounds = array<i64: 2, 1>, scalar_prefetch = 0 : i64, scratch_operands = 0 : i64, tpu.core_type = #tpu.core_type<tc>, window_params = [{transform_indices = @transform_0, window_bounds = array<i64: 1, 16, 65>}, {transform_indices = @transform_1, window_bounds = array<i64: 1, 34, 16>}, {pipeline_mode = #tpu.pipeline_mode<synchronous>, transform_indices = @transform_2, window_bounds = array<i64: 3, 65, 256>}, {transform_indices = @transform_3, window_bounds = array<i64: 1, 32, 256>}]} {
    %c0 = arith.constant 0 : index
    %c0_0 = arith.constant 0 : index
    %c0_1 = arith.constant 0 : index
    %0 = vector.load %arg3[%c0, %c0_0, %c0_1] : memref<1x34x16xf32, #tpu.memory_space<vmem>>, vector<1x34x16xf32>
    %1 = vector.shape_cast %0 : vector<1x34x16xf32> to vector<34x16xf32>
    %c0_2 = arith.constant 0 : index
    %c0_3 = arith.constant 0 : index
    %c0_4 = arith.constant 0 : index
    %2 = vector.load %arg2[%c0_2, %c0_3, %c0_4] : memref<1x16x65xf32, #tpu.memory_space<vmem>>, vector<1x16x65xf32>
    %3 = vector.shape_cast %2 : vector<1x16x65xf32> to vector<16x65xf32>
    %cst = arith.constant dense<0.000000e+00> : vector<34x65xf32>
    %4 = tpu.matmul %1, %3, %cst {dimension_numbers = #tpu.dot_dimension_numbers<[1], [0], [0], [1], [0, 0, 1, 1], [], []>, precision = #tpu.contract_precision<fp32>} : vector<34x16xf32>, vector<16x65xf32>, vector<34x65xf32> -> vector<34x65xf32>
    %cst_5 = arith.constant 0.000000e+00 : f32
    %5 = vector.broadcast %cst_5 : f32 to vector<32x256xf32>
    %c0_6 = arith.constant 0 : index
    %c0_7 = arith.constant 0 : index
    %c0_8 = arith.constant 0 : index
    %6 = vector.load %arg4[%c0_6, %c0_7, %c0_8] : memref<3x65x256xf32, #tpu.memory_space<vmem>>, vector<1x65x256xf32>
    %7 = vector.shape_cast %6 : vector<1x65x256xf32> to vector<65x256xf32>
    %cst_9 = arith.constant dense<0.000000e+00> : vector<34x256xf32>
    %8 = tpu.matmul %4, %7, %cst_9 {dimension_numbers = #tpu.dot_dimension_numbers<[1], [0], [0], [1], [0, 0, 1, 1], [], []>, precision = #tpu.contract_precision<fp32>} : vector<34x65xf32>, vector<65x256xf32>, vector<34x256xf32> -> vector<34x256xf32>
    %9 = vector.extract_strided_slice %8 {offsets = [0, 0], sizes = [32, 256], strides = [1, 1]} : vector<34x256xf32> to vector<32x256xf32>
    %10 = arith.addf %5, %9 : vector<32x256xf32>
    %c1 = arith.constant 1 : index
    %c0_10 = arith.constant 0 : index
    %c0_11 = arith.constant 0 : index
    %11 = vector.load %arg4[%c1, %c0_10, %c0_11] : memref<3x65x256xf32, #tpu.memory_space<vmem>>, vector<1x65x256xf32>
    %12 = vector.shape_cast %11 : vector<1x65x256xf32> to vector<65x256xf32>
    %cst_12 = arith.constant dense<0.000000e+00> : vector<34x256xf32>
    %13 = tpu.matmul %4, %12, %cst_12 {dimension_numbers = #tpu.dot_dimension_numbers<[1], [0], [0], [1], [0, 0, 1, 1], [], []>, precision = #tpu.contract_precision<fp32>} : vector<34x65xf32>, vector<65x256xf32>, vector<34x256xf32> -> vector<34x256xf32>
    %14 = vector.extract_strided_slice %13 {offsets = [1, 0], sizes = [32, 256], strides = [1, 1]} : vector<34x256xf32> to vector<32x256xf32>
    %15 = arith.addf %10, %14 : vector<32x256xf32>
    %c2 = arith.constant 2 : index
    %c0_13 = arith.constant 0 : index
    %c0_14 = arith.constant 0 : index
    %16 = vector.load %arg4[%c2, %c0_13, %c0_14] : memref<3x65x256xf32, #tpu.memory_space<vmem>>, vector<1x65x256xf32>
    %17 = vector.shape_cast %16 : vector<1x65x256xf32> to vector<65x256xf32>
    %cst_15 = arith.constant dense<0.000000e+00> : vector<34x256xf32>
    %18 = tpu.matmul %4, %17, %cst_15 {dimension_numbers = #tpu.dot_dimension_numbers<[1], [0], [0], [1], [0, 0, 1, 1], [], []>, precision = #tpu.contract_precision<fp32>} : vector<34x65xf32>, vector<65x256xf32>, vector<34x256xf32> -> vector<34x256xf32>
    %19 = vector.extract_strided_slice %18 {offsets = [2, 0], sizes = [32, 256], strides = [1, 1]} : vector<34x256xf32> to vector<32x256xf32>
    %20 = arith.addf %15, %19 : vector<32x256xf32>
    %c0_16 = arith.constant 0 : index
    %c0_17 = arith.constant 0 : index
    %c0_18 = arith.constant 0 : index
    %21 = vector.load %arg5[%c0_16, %c0_17, %c0_18] : memref<1x32x256xf32, #tpu.memory_space<vmem>>, vector<1x32x256xf32>
    %22 = vector.shape_cast %21 : vector<1x32x256xf32> to vector<32x256xf32>
    %23 = vector.shape_cast %20 : vector<32x256xf32> to vector<1x32x256xf32>
    tpu.vector_store %arg5[%c0_16, %c0_17, %c0_18], %23 {strides = array<i32>} : memref<1x32x256xf32, #tpu.memory_space<vmem>>, vector<1x32x256xf32>,
    return
  }
  func.func @transform_0(%arg0: i32, %arg1: i32) -> (i32, i32, i32) {
    %c0_i32 = arith.constant 0 : i32
    %c0_i32_0 = arith.constant 0 : i32
    %c0_i32_1 = arith.constant 0 : i32
    return %arg0, %c0_i32, %c0_i32_0 : i32, i32, i32
  }
  func.func @transform_1(%arg0: i32, %arg1: i32) -> (i32, i32, i32) {
    %c0_i32 = arith.constant 0 : i32
    %c0_i32_0 = arith.constant 0 : i32
    %c0_i32_1 = arith.constant 0 : i32
    return %arg1, %c0_i32, %c0_i32_0 : i32, i32, i32
  }
  func.func @transform_2(%arg0: i32, %arg1: i32) -> (i32, i32, i32) {
    %c0_i32 = arith.constant 0 : i32
    %c0_i32_0 = arith.constant 0 : i32
    %c0_i32_1 = arith.constant 0 : i32
    %c0_i32_2 = arith.constant 0 : i32
    return %c0_i32, %c0_i32_0, %c0_i32_1 : i32, i32, i32
  }
  func.func @transform_3(%arg0: i32, %arg1: i32) -> (i32, i32, i32) {
    %c0_i32 = arith.constant 0 : i32
    %c0_i32_0 = arith.constant 0 : i32
    return %arg0, %arg1, %c0_i32 : i32, i32, i32
  }
}

</mosaic_0001>

<bundles_post_ra>
// kernel: tpu_custom_call.1
= control target key start
LH: loop header
LB: loop body
LE: loop exit
PB: predicated region body
PF: predicated region fallthrough
CT: control target
= control target key end

     0   :  { %8 = vsyncpa [#allocation3], 0  ;;  %s5659_s0 = inlined_call_operand.vmem [shape: f32[2,16,65], index: 0, kind: input, shape index: {}]   ;;  %s5660_s1 = inlined_call_operand.vmem [shape: f32[1,34,16], index: 1, kind: input, shape index: {}]   ;;  %s5661_s2 = inlined_call_operand.hbm [shape: f32[3,65,256], index: 2, kind: input, shape index: {}]   ;;  %s5662_s3 = inlined_call_operand.hbm [shape: f32[2,32,256], index: 3, kind: output, shape index: {}]  }
   0x1   :  { %9 = vsyncpa [#allocation4], 0 }
   0x2   :  { %11 = vsyncpa [#allocation4 + $0x1], 0  ;;  %s4164_s12 = smov 0   ;;  %s4166_s13 = smov 0  }
   0x3   :  { %s4168_s14 = smov 0   ;;  %s4170_s15 = smov 0  }
   0x4   :  { %s4172_s16 = smov 0   ;;  %s4174_s17 = smov 0  }
   0x5 LB: > { %s3782_s18 = sadd.s32 4294967295, %s4134_s17   ;;  %s3783_s19 = sadd.s32 4294967294, %s4134_s17   ;;  %s4134_s17 = sphi %s4174_s17, %s17_s17   ;;  %s4130_s16 = sphi %s4172_s16, %s5852_s16   ;;  %s4126_s15 = sphi %s4170_s15, %s5851_s15   ;;  %s4122_s14 = sphi %s4168_s14, %s5850_s14   ;;  %s4118_s13 = sphi %s4166_s13, %s5849_s13   ;;  %s4114_s12 = sphi %s4164_s12, %s5848_s12  }
   0x6   : > { %s29_s20 = sadd.s32 1, %s4130_s16  ;;  %s111_s21 = sadd.s32 1, %s4122_s14 }
   0x7   : > { %p31_p0 = scmp.ge.s32.totalorder %s29_s20, 2  ;;  %p121_p1 = scmp.ne.s32.totalorder %s4122_s14, %s4118_s13 }
   0x8   : > { %p122_p2 = scmp.eq.s32.totalorder %s3782_s18, 1  ;;  %p127_p3 = scmp.ne.s32.totalorder %s4118_s13, %s4114_s12 }
   0x9   : > { %s5854_s20 = smov (%p31_p0, %s29_s20), 0  ;;  %p128_p5 = scmp.eq.s32.totalorder %s3783_s19, 1 }
   0xa   : > { %p4204_p4 = por %p122_p2, %p121_p1  ;;  %s106_s23 = ssub.s32 %s4130_s16, %s5854_s20 }
   0xb   : > { %p3784_p6 = scmp.ge.s32.totalorder %s4134_s17, 1  ;;  %p109_p7 = scmp.eq.s32.totalorder %s106_s23, 0 }
   0xc   : > { %p4211_p8 = por %p128_p5, %p127_p3  ;;  %p135_p9 = scmp.lt.s32.totalorder %s4134_s17, 3 }
   0xd   : > { %s4217_s25 = scalar_select %p109_p7, %s4122_s14, %s111_s21  }
   0xe   : > { %p4219_p10 = pnand %p3784_p6, %p135_p9  ;;  %p4223_p11 = scmp.eq.s32.totalorder %s3782_s18, 0 }
   0xf   : > { %s4136_s28 = smov [#allocation2]  }
  0x10   : > { %p3962_p12 = pneg %p4219_p10  ;;  %s155_s29 = sshll.u32 %s4136_s28, 4  ;;  %s156_s29 = int_to_ptr.vmem [resolvable:$true] %s155_s29 }
  0x11   : > { %s4039_s30 = scalar_lea.vmem %s156_s29, 6912  ;;  %p4047_p5 = scmp.lt.s32.totalorder %s156_s29, %s156_s29 }
  0x12   : > { %p3963_p13 = pnand %p4223_p11, %p3962_p12  ;;  %p4040_p1 = scmp.ne.s32.totalorder %s156_s29, %s4039_s30 }
  0x13   : > { %p4048_p6 = scmp.lt.s32.totalorder %s4039_s30, %s4039_s30 }
  0x14   : > { %p4030_p0 = pneg %p3963_p13 }
  0x15   : > { %p4049_p7 = por %p4048_p6, %p4047_p5 }
  0x16   : > { %p4042_p2 = pnand %p4040_p1, %p4030_p0 }
  0x18   : > { %p4043_p3 = pneg %p4042_p2 }
  0x1a   : > { %p4050_p9 = pnand %p4049_p7, %p4043_p3 }
  0x1c   : > { %4053 = shalt.err (!%p4050_p9)
}
  0x1d   : > { %s4137_s4 = smov 256   ;;  %s4138_s5 = smov 16  }
  0x1e   : > { %3965 = dma.hbm_to_vmem [thread:$0]  (!%p3963_p13), %s5661_s2, 6912, %s156_s29, [#allocation3], %s4137_s4, %s4137_s4, %s4138_s5  }
  0x1f   : > { %179 = sbr.rel (%p4219_p10) target bundleno = 757 (0x2f5), region = 32 }
  0x24   : > { %4105 = dma.done.wait (%p4223_p11), [#allocation3], 6912  }
  0x25   : > { %4107 = vsyncadd (%p4223_p11), [#allocation3], 4294960384  ;;  %p208_p12 = scmp.lt.s32.totalorder %s4126_s15, 1  ;;  %v5681_v0 = vmov 0.0   ;;  %vm4140_vm0 = vmmov 0   ;;  %vm226_vm1 = vcmask 130048  }
  0x26   : > { %3842 = vmatprep.subr.mxu0 %v5681_v0  ;;  %3861 = vmatprep.subr.mxu1 %v5681_v0  ;;  %v219_v3 = vld [vmem:[%s5660_s1] sm:$0xff]  ;;  %v220_v7 = vld [vmem:[%s5660_s1 + $0x8] sm:$0xff]  ;;  %v221_v8 = vld [vmem:[%s5660_s1 + $0x10] sm:$0xff]  ;;  %vm907_vm2 = vcmask 1040384   ;;  %vm891_vm3 = vcmask 531456   ;;  %vm2683_vm4 = vcmask 1046528  }
  0x27   : > { %s209_s8 = scalar_select %p208_p12, %s4126_s15, 1  ;;  %3846 = vmatprep.mubr.msk.f32.mxu0 %vm4140_vm0, %v5681_v0  ;;  %3865 = vmatprep.mubr.msk.f32.mxu1 %vm4140_vm0, %v5681_v0  ;;  %v228_v6 = vsel %vm226_vm1, %v219_v3, 0  ;;  %v222_v9 = vld [vmem:[%s5660_s1 + $0x18] sm:$0xff]  ;;  %v231_v11 = vsel %vm226_vm1, %v220_v7, 0  ;;  %v234_v12 = vsel %vm226_vm1, %v221_v8, 0  ;;  %v887_v57 = vld [vmem:[#allocation2 + $0x70] sm:$0xff] }
  0x28   : > { %v4268_v10 = vand.u32 4294901760, %v228_v6  ;;  %v237_v13 = vsel %vm226_vm1, %v222_v9, 0  ;;  %v223_v14 = vld [vmem:[%s5660_s1 + $0x20] sm:$0x3]  ;;  %v4283_v17 = vand.u32 4294901760, %v231_v11  ;;  %v4285_v18 = vand.u32 4294901760, %v234_v12 }
  0x29   : > { %s3798_s9 = sshll.u32 %s209_s8, 4  ;;  %v4291_v20 = vand.u32 4294901760, %v237_v13  ;;  %v240_v21 = vsel %vm226_vm1, %v223_v14, 0  ;;  %v890_v48 = vld [vmem:[#allocation2 + $0x88] sm:$0x1]  ;;  %v888_v54 = vld [vmem:[#allocation2 + $0x78] sm:$0xff] }
  0x2a   : > { %s212_s18 = scalar_lea.vmem %s5659_s0, %s3798_s9  ;;  %v4289_v19 = vsub.f32 %v228_v6, %v4268_v10  ;;  %v4298_v24 = vsub.f32 %v231_v11, %v4283_v17  ;;  %v4301_v25 = vsub.f32 %v234_v12, %v4285_v18  ;;  %v4315_v33 = vand.u32 4294901760, %v240_v21  ;;  %v889_v50 = vld [vmem:[#allocation2 + $0x80] sm:$0x1]  ;;  %v886_v60 = vld [vmem:[#allocation2 + $0x68] sm:$0xff]  ;;  %s205_s6 = sand.u32 1, %s4118_s13  }
  0x2b   : > { %v225_v1 = vld [vmem:[%s212_s18 + $0x8] sm:$0xff]  ;;  %v224_v2 = vld [vmem:[%s212_s18] sm:$0xff]  ;;  %v4313_v32 = vsub.f32 %v237_v13, %v4291_v20  ;;  %v912_v49 = vsel %vm907_vm2, %v890_v48, 0  ;;  %v909_v52 = vsel %vm907_vm2, %v889_v50, 0  ;;  %v4428_v56 = vand.u32 4294901760, %v888_v54  ;;  %v875_v50 = vld [vmem:[#allocation2 + $0x10] sm:$0xff] }
  0x2c   : > { %v4254_v4 = vand.u32 4294901760, %v225_v1  ;;  %v4256_v5 = vand.u32 4294901760, %v224_v2  ;;  %v311_v26 = vand.u32 4294901760, %v4289_v19  ;;  %v321_v29 = vand.u32 4294901760, %v4298_v24  ;;  %s3790_s7 = sshll.u32 %s205_s6, 6  ;;  %s3799_s9 = sshll.u32 %s4126_s15, 10 }
  0x2d   : > { %v331_v31 = vand.u32 4294901760, %v4301_v25  ;;  %v341_v40 = vand.u32 4294901760, %v4313_v32  ;;  %v350_v41 = vsub.f32 %v240_v21, %v4315_v33  ;;  %v4420_v51 = vand.u32 4294901760, %v912_v49  ;;  %s5578_s8 = scalar_lea.vmem [#allocation5], %s3790_s7  ;;  %s5605_s19 = scalar_lea.hbm %s5662_s3, %s3799_s9 }
  0x2e   : > { %3843 = vmatpush3.msra.mxu0 %v4254_v4  ;;  %v4278_v15 = vsub.f32 %v225_v1, %v4254_v4  ;;  %v4281_v16 = vsub.f32 %v224_v2, %v4256_v5  ;;  %v312_v30 = vsub.f32 %v4289_v19, %v311_v26  ;;  %v322_v36 = vsub.f32 %v4298_v24, %v321_v29  ;;  %v885_v1 = vld [vmem:[#allocation2 + $0x60] sm:$0xff]  ;;  %s3682_s10 = sshll.u32 %s5578_s8, 4  ;;  %s5614_s15 = scalar_lea.sflag [#allocation4], %s205_s6  ;;  %s5607_s10 = int_to_ptr.vmem [resolvable:$true] %s3682_s10 }
  0x2f   : > { %3844 = vmatprep.subr.mxu0 %v5681_v0  ;;  %v332_v39 = vsub.f32 %v4301_v25, %v331_v31  ;;  %v342_v43 = vsub.f32 %v4313_v32, %v341_v40  ;;  %v351_v44 = vand.u32 4294901760, %v350_v41  ;;  %5734 = vst [vmem:[#allocation8_spill] sm:$0xff] %v4420_v51  ;;  %v4423_v53 = vand.u32 4294901760, %v909_v52  ;;  %s4054_s21 = scalar_lea.vmem %s5607_s10, 1024  ;;  %s4141_s23 = smov [#allocation5]  }
  0x30   : > { %3845 = vmatpush3.msra.mxu0 %v4256_v5  ;;  %v390_v22 = vand.u32 4294901760, %v4278_v15  ;;  %v397_v23 = vand.u32 4294901760, %v4281_v16  ;;  %v313_v37 = vand.u32 4294901760, %v312_v30  ;;  %v323_v38 = vand.u32 4294901760, %v322_v36  ;;  %v879_v30 = vld [vmem:[#allocation2 + $0x30] sm:$0xff]  ;;  %p4055_p10 = scmp.ne.s32.totalorder %s5607_s10, %s4054_s21  ;;  %s4058_s26 = sshll.u32 %s4141_s23, 4  ;;  %s4059_s26 = int_to_ptr.vmem [resolvable:$false] %s4058_s26 }
  0x31   : > { %3880 = vmatprep.subr.mxu0 %v5681_v0  ;;  %v333_v42 = vand.u32 4294901760, %v332_v39  ;;  %v343_v45 = vand.u32 4294901760, %v342_v43  ;;  %v352_v46 = vsub.f32 %v350_v41, %v351_v44  ;;  %v4426_v55 = vsub.f32 %v912_v49, %v4420_v51  ;;  %s4060_s27 = scalar_lea.vmem %s4059_s26, 2048  ;;  %p4061_p0 = scmp.lt.s32.totalorder %s5607_s10, %s4059_s26 }
  0x32   : > { %v391_v27 = vsub.f32 %v4278_v15, %v390_v22  ;;  %v398_v28 = vsub.f32 %v4281_v16, %v397_v23  ;;  %3847 = vmatmul.mubr.f32.vlgmr.msra.gmra.mxu0 %v313_v37  ;;  %v4432_v58 = vsub.f32 %v909_v52, %v4423_v53  ;;  %v4434_v59 = vand.u32 4294901760, %v887_v57  ;;  %p4056_p11 = pnand %p4055_p10, %p4204_p4  ;;  %p4062_p1 = scmp.lt.s32.totalorder %s4060_s27, %s4054_s21 }
  0x33   : > { %3881 = vmatpush3.msra.mxu0 %v4278_v15  ;;  %3849 = vmatprep.mubr.msk.f32.mxu0 %vm4140_vm0, %v5681_v0  ;;  %v353_v47 = vand.u32 4294901760, %v352_v46  ;;  %5735 = vst [vmem:[#allocation9_spill] sm:$0xff] %v4426_v55  ;;  %v5680_v61 = vand.u32 4294901760, %v4426_v55  ;;  %v4439_v62 = vsub.f32 %v888_v54, %v4428_v56  ;;  %v4441_v63 = vand.u32 4294901760, %v886_v60  ;;  %v882_v15 = vld [vmem:[#allocation2 + $0x48] sm:$0xff] }
  0x34   : > { %v392_v34 = vand.u32 4294901760, %v391_v27  ;;  %v399_v35 = vand.u32 4294901760, %v398_v28  ;;  %3882 = vmatprep.subr.mxu0 %v5681_v0  ;;  %v5679_v2 = vand.u32 4294901760, %v4432_v58  ;;  %v4446_v3 = vsub.f32 %v887_v57, %v4434_v59  ;;  %p4057_p13 = pneg %p4056_p11  ;;  %p4063_p2 = por %p4062_p1, %p4061_p0 }
  0x35   : > { %3883 = vmatpush3.msra.mxu0 %v4281_v16  ;;  %v1067_v6 = vsub.f32 %v4426_v55, %v5680_v61  ;;  %v5678_v7 = vand.u32 4294901760, %v4439_v62  ;;  %v4456_v8 = vsub.f32 %v886_v60, %v4441_v63  ;;  %vm3622_vm5 = vcmask 1045504  }
  0x36   : > { %3862 = vmatpush3.msra.mxu1 %v392_v34  ;;  %3850 = vmatmul.mubr.f32.gmra.mxu0 %v323_v38  ;;  %v1073_v11 = vsub.f32 %v4432_v58, %v5679_v2  ;;  %v5677_v12 = vand.u32 4294901760, %v4446_v3  ;;  %p4064_p3 = pnand %p4063_p2, %p4057_p13 }
  0x37   : > { %3863 = vmatprep.subr.mxu1 %v5681_v0  ;;  %3852 = vmatprep.mubr.msk.f32.mxu0 %vm4140_vm0, %v5681_v0  ;;  %v1068_v16 = vand.u32 4294901760, %v1067_v6 }
  0x38   : > { %3864 = vmatpush3.msra.mxu1 %v399_v35  ;;  %3918 = vmatprep.subr.mxu0 %v5681_v0  ;;  %v1074_v21 = vand.u32 4294901760, %v1073_v11  ;;  %v878_v35 = vld [vmem:[#allocation2 + $0x28] sm:$0xff] }
  0x39   : > { %3866 = vmatmul.mubr.f32.vlgmr.msra.gmra.mxu1 %v4268_v10  ;;  %3899 = vmatprep.subr.mxu1 %v5681_v0  ;;  %v4521_v49 = vand.u32 4294901760, %v878_v35 }
  0x3a   : > { %3900 = vmatpush3.msra.mxu1 %v4254_v4  ;;  %3868 = vmatprep.mubr.msk.f32.mxu1 %vm4140_vm0, %v5681_v0 }
  0x3b   : > { %3901 = vmatprep.subr.mxu1 %v5681_v0  ;;  %3853 = vmatmul.mubr.f32.gmra.mxu0 %v333_v42  ;;  %v4536_v6 = vsub.f32 %v878_v35, %v4521_v49 }
  0x3c   : > { %3902 = vmatpush3.msra.mxu1 %v4256_v5  ;;  %3855 = vmatprep.mubr.msk.f32.mxu0 %vm4140_vm0, %v5681_v0 }
  0x3d   : > { %3869 = vmatmul.mubr.f32.gmra.mxu1 %v4283_v17  ;;  %3937 = vmatprep.subr.mxu1 %v5681_v0  ;;  %5736 = vst [vmem:[#allocation10_spill] sm:$0xff] %v4536_v6 }
  0x3e   : > { %3871 = vmatprep.mubr.msk.f32.mxu1 %vm4140_vm0, %v5681_v0 }
  0x3f   : > { %3856 = vmatmul.mubr.f32.gmra.mxu0 %v343_v45  ;;  %v876_v45 = vld [vmem:[#allocation2 + $0x18] sm:$0xff] }
  0x40   : > { %3858 = vmatprep.mubr.msk.f32.mxu0 %vm4140_vm0, %v5681_v0 }
  0x41   : > { %3872 = vmatmul.mubr.f32.gmra.mxu1 %v4285_v18 }
  0x42   : > { %3874 = vmatprep.mubr.msk.f32.mxu1 %vm4140_vm0, %v5681_v0 }
  0x43   : > { %3859 = vmatmul.mubr.f32.gmra.mxu0 %v353_v47 }
  0x44   : > { %3884 = vmatprep.mubr.msk.f32.mxu0 %vm4140_vm0, %v5681_v0 }
  0x45   : > { %3875 = vmatmul.mubr.f32.gmra.mxu1 %v4291_v20 }
  0x46   : > { %3877 = vmatprep.mubr.msk.f32.mxu1 %vm4140_vm0, %v5681_v0 }
  0x47   : > { %3885 = vmatmul.mubr.f32.vlgmr.msra.gmra.mxu0 %v4289_v19 }
  0x48   : > { %3919 = vmatpush3.msra.mxu0 %v390_v22  ;;  %3887 = vmatprep.mubr.msk.f32.mxu0 %vm4140_vm0, %v5681_v0  ;;  %v1085_v22 = vsub.f32 %v4446_v3, %v5677_v12 }
  0x49   : > { %3878 = vmatmul.mubr.f32.gmra.mxu1 %v4315_v33  ;;  %3920 = vmatprep.subr.mxu0 %v5681_v0 }
  0x4a   : > { %3903 = vmatprep.mubr.msk.f32.mxu1 %vm4140_vm0, %v5681_v0  ;;  %3921 = vmatpush3.msra.mxu0 %v397_v23 }
  0x4b   : > { %3888 = vmatmul.mubr.f32.gmra.mxu0 %v4298_v24  ;;  %929 = vmatprep.subr.mxu0 %v4420_v51 }
  0x4c   : > { %3890 = vmatprep.mubr.msk.f32.mxu0 %vm4140_vm0, %v5681_v0 }
  0x4d   : > { %3904 = vmatmul.mubr.f32.vlgmr.msra.gmra.mxu1 %v311_v26 }
  0x4e   : > { %3938 = vmatpush3.msra.mxu1 %v4254_v4  ;;  %3906 = vmatprep.mubr.msk.f32.mxu1 %vm4140_vm0, %v5681_v0  ;;  %v4448_v4 = vand.u32 4294901760, %v885_v1 }
  0x4f   : > { %3939 = vmatprep.subr.mxu1 %v5681_v0  ;;  %3891 = vmatmul.mubr.f32.gmra.mxu0 %v4301_v25  ;;  %v880_v25 = vld [vmem:[#allocation2 + $0x38] sm:$0xff] }
  0x50   : > { %3940 = vmatpush3.msra.mxu1 %v4256_v5  ;;  %3893 = vmatprep.mubr.msk.f32.mxu0 %vm4140_vm0, %v5681_v0  ;;  %v884_v5 = vld [vmem:[#allocation2 + $0x58] sm:$0xff]  ;;  %v4466_v13 = vsub.f32 %v885_v1, %v4448_v4  ;;  %v4505_v39 = vand.u32 4294901760, %v880_v25 }
  0x51   : > { %3907 = vmatmul.mubr.f32.gmra.mxu1 %v321_v29  ;;  %v4458_v9 = vand.u32 4294901760, %v884_v5  ;;  %1069 = vmatprep.subr.mxu1 %v1068_v16  ;;  %v4491_v29 = vand.u32 4294901760, %v882_v15 }
  0x52   : > { %3909 = vmatprep.mubr.msk.f32.mxu1 %vm4140_vm0, %v5681_v0  ;;  %v5675_v23 = vand.u32 4294901760, %v4466_v13  ;;  %v4519_v48 = vsub.f32 %v880_v25, %v4505_v39  ;;  %v5666_v25 = vand.u32 4294901760, %v4536_v6 }
  0x53   : > { %3894 = vmatmul.mubr.f32.gmra.mxu0 %v4313_v32  ;;  %v4476_v19 = vsub.f32 %v884_v5, %v4458_v9  ;;  %v4503_v38 = vsub.f32 %v882_v15, %v4491_v29 }
  0x54   : > { %3896 = vmatprep.mubr.msk.f32.mxu0 %vm4140_vm0, %v5681_v0  ;;  %v1097_v32 = vsub.f32 %v4466_v13, %v5675_v23  ;;  %v5669_v5 = vand.u32 4294901760, %v4519_v48 }
  0x55   : > { %3910 = vmatmul.mubr.f32.gmra.mxu1 %v331_v31  ;;  %v5674_v28 = vand.u32 4294901760, %v4476_v19  ;;  %v1086_v31 = vand.u32 4294901760, %v1085_v22  ;;  %v5672_v47 = vand.u32 4294901760, %v4503_v38 }
  0x56   : > { %3912 = vmatprep.mubr.msk.f32.mxu1 %vm4140_vm0, %v5681_v0  ;;  %v1127_v22 = vsub.f32 %v4519_v48, %v5669_v5 }
  0x57   : > { %3897 = vmatmul.mubr.f32.gmra.mxu0 %v350_v41  ;;  %v1103_v37 = vsub.f32 %v4476_v19, %v5674_v28  ;;  %v1098_v41 = vand.u32 4294901760, %v1097_v32  ;;  %v1115_v1 = vsub.f32 %v4503_v38, %v5672_v47 }
  0x58   : > { %3922 = vmatprep.mubr.msk.f32.mxu0 %vm4140_vm0, %v5681_v0 }
  0x59   : > { %3913 = vmatmul.mubr.f32.gmra.mxu1 %v341_v40  ;;  %v877_v40 = vld [vmem:[#allocation2 + $0x20] sm:$0xff]  ;;  %v1104_v46 = vand.u32 4294901760, %v1103_v37  ;;  %v1139_v37 = vsub.f32 %v4536_v6, %v5666_v25 }
  0x5a   : > { %3915 = vmatprep.mubr.msk.f32.mxu1 %vm4140_vm0, %v5681_v0  ;;  %v4528_v60 = vand.u32 4294901760, %v877_v40 }
  0x5b   : > { %3923 = vmatmul.mubr.f32.vlgmr.msra.gmra.mxu0 %v4268_v10 }
  0x5c   : > { %3925 = vmatprep.mubr.msk.f32.mxu0 %vm4140_vm0, %v5681_v0  ;;  %931 = vmatpush1.msra.mxu0 %v4423_v53  ;;  %v4546_v16 = vsub.f32 %v877_v40, %v4528_v60 }
  0x5d   : > { %3916 = vmatmul.mubr.f32.gmra.mxu1 %v351_v44  ;;  %933 = vmatprep.subr.mxu0 %v4428_v56  ;;  %v4514_v44 = vand.u32 4294901760, %v879_v30 }
  0x5e   : > { %3941 = vmatprep.mubr.msk.f32.mxu1 %vm4140_vm0, %v5681_v0  ;;  %935 = vmatpush1.msra.mxu0 %v4434_v59  ;;  %5737 = vst [vmem:[#allocation11_spill] sm:$0xff] %v4546_v16  ;;  %v5665_v32 = vand.u32 4294901760, %v4546_v16 }
  0x5f   : > { %3926 = vmatmul.mubr.f32.gmra.mxu0 %v4283_v17  ;;  %937 = vmatprep.subr.mxu0 %v4441_v63  ;;  %v4526_v57 = vsub.f32 %v879_v30, %v4514_v44 }
  0x60   : > { %3928 = vmatprep.mubr.msk.f32.mxu0 %vm4140_vm0, %v5681_v0  ;;  %939 = vmatpush1.msra.mxu0 %v4448_v4 }
  0x61   : > { %3942 = vmatmul.mubr.f32.vlgmr.msra.gmra.mxu1 %v4268_v10  ;;  %v883_v10 = vld [vmem:[#allocation2 + $0x50] sm:$0xff]  ;;  %941 = vmatprep.subr.mxu0 %v4458_v9  ;;  %v5668_v15 = vand.u32 4294901760, %v4526_v57 }
  0x62   : > { %3944 = vmatprep.mubr.msk.f32.mxu1 %vm4140_vm0, %v5681_v0  ;;  %v4468_v14 = vand.u32 4294901760, %v883_v10  ;;  %1075 = vmatpush1.msra.mxu1 %v1074_v21  ;;  %v1116_v21 = vand.u32 4294901760, %v1115_v1 }
  0x63   : > { %3929 = vmatmul.mubr.f32.gmra.mxu0 %v4285_v18 }
  0x64   : > { %3931 = vmatprep.mubr.msk.f32.mxu0 %vm4140_vm0, %v5681_v0  ;;  %v4484_v24 = vsub.f32 %v883_v10, %v4468_v14  ;;  %943 = vmatpush1.msra.mxu0 %v4468_v14  ;;  %v4538_v10 = vand.u32 4294901760, %v876_v45 }
  0x65   : > { %3945 = vmatmul.mubr.f32.gmra.mxu1 %v4283_v17  ;;  %v1079_v17 = vsub.f32 %v4439_v62, %v5678_v7  ;;  %945 = vmatprep.subr.mxu0 %v4491_v29 }
  0x66   : > { %3947 = vmatprep.mubr.msk.f32.mxu1 %vm4140_vm0, %v5681_v0 }
  0x67   : > { %3932 = vmatmul.mubr.f32.gmra.mxu0 %v4291_v20  ;;  %v1080_v26 = vand.u32 4294901760, %v1079_v17  ;;  %v4548_v17 = vand.u32 4294901760, %v875_v50 }
  0x68   : > { %3934 = vmatprep.mubr.msk.f32.mxu0 %vm4140_vm0, %v5681_v0 }
  0x69   : > { %3948 = vmatmul.mubr.f32.gmra.mxu1 %v4285_v18  ;;  %v5676_v18 = vand.u32 4294901760, %v4456_v8  ;;  %1081 = vmatprep.subr.mxu1 %v1080_v26  ;;  %v4556_v26 = vsub.f32 %v876_v45, %v4538_v10  ;;  %v4564_v35 = vsub.f32 %v875_v50, %v4548_v17  ;;  %v1145_v45 = vsub.f32 %v4546_v16, %v5665_v32 }
  0x6a   : > { %3950 = vmatprep.mubr.msk.f32.mxu1 %vm4140_vm0, %v5681_v0  ;;  %1087 = vmatpush1.msra.mxu1 %v1086_v31  ;;  %v1133_v31 = vsub.f32 %v4526_v57, %v5668_v15 }
  0x6b   : > { %3935 = vmatmul.mubr.f32.gmra.mxu0 %v4315_v33  ;;  %v1091_v27 = vsub.f32 %v4456_v8, %v5676_v18  ;;  %5738 = vst [vmem:[#allocation12_spill] sm:$0xff] %v4556_v26  ;;  %5739 = vst [vmem:[#allocation13_spill] sm:$0xff] %v4564_v35  ;;  %v5664_v40 = vand.u32 4294901760, %v4556_v26 }
  0x6c   : > { %996 = vmatprep.mubr.f32.mxu0 %v5681_v0 }
  0x6d   : > { %3951 = vmatmul.mubr.f32.gmra.mxu1 %v4291_v20  ;;  %v881_v20 = vld [vmem:[#allocation2 + $0x40] sm:$0xff]  ;;  %v1092_v36 = vand.u32 4294901760, %v1091_v27  ;;  %v1151_v1 = vsub.f32 %v4556_v26, %v5664_v40 }
  0x6e   : > { %3953 = vmatprep.mubr.msk.f32.mxu1 %vm4140_vm0, %v5681_v0  ;;  %v4497_v34 = vand.u32 4294901760, %v881_v20  ;;  %v873_v27 = vld [vmem:[#allocation2] sm:$0xff] }
  0x6f   : > { %1093 = vmatprep.subr.mxu1 %v1092_v36  ;;  %v1128_v36 = vand.u32 4294901760, %v1127_v22  ;;  %v4577_v50 = vand.u32 4294901760, %v873_v27 }
  0x70   : > { %v4512_v43 = vsub.f32 %v881_v20, %v4497_v34  ;;  %947 = vmatpush1.msra.mxu0 %v4497_v34  ;;  %1099 = vmatpush1.msra.mxu1 %v1098_v41  ;;  %v874_v20 = vld [vmem:[#allocation2 + $0x8] sm:$0xff] }
  0x71   : > { %3954 = vmatmul.mubr.f32.gmra.mxu1 %v4315_v33  ;;  %v5673_v33 = vand.u32 4294901760, %v4484_v24  ;;  %949 = vmatprep.subr.mxu0 %v4505_v39  ;;  %v4571_v41 = vand.u32 4294901760, %v874_v20 }
  0x72   : > { %1204 = vmatprep.mubr.f32.mxu1 %v5681_v0  ;;  %v5670_v54 = vand.u32 4294901760, %v4512_v43  ;;  %951 = vmatpush1.msra.mxu0 %v4514_v44 }
  0x73   : > { %v1109_v42 = vsub.f32 %v4484_v24, %v5673_v33  ;;  %1105 = vmatprep.subr.mxu1 %v1104_v46  ;;  %953 = vmatprep.subr.mxu0 %v4521_v49  ;;  %v5663_v46 = vand.u32 4294901760, %v4564_v35 }
  0x74   : > { %v1121_v11 = vsub.f32 %v4512_v43, %v5670_v54  ;;  %955 = vmatpush1.msra.mxu0 %v4528_v60 }
  0x75   : > { %v1110_v52 = vand.u32 4294901760, %v1109_v42  ;;  %957 = vmatprep.subr.mxu0 %v4538_v10  ;;  %v1134_v42 = vand.u32 4294901760, %v1133_v31  ;;  %v1157_v22 = vsub.f32 %v4564_v35, %v5663_v46  ;;  %v1152_v31 = vand.u32 4294901760, %v1151_v1 }
  0x76   : > { %v1122_v30 = vand.u32 4294901760, %v1121_v11  ;;  %959 = vmatpush1.msra.mxu0 %v4548_v17  ;;  %v4583_v11 = vsub.f32 %v874_v20, %v4571_v41 }
  0x77   : > { %1111 = vmatpush1.msra.mxu1 %v1110_v52  ;;  %v1140_v52 = vand.u32 4294901760, %v1139_v37  ;;  %961 = vmatprep.subr.mxu0 %v4571_v41  ;;  %v1158_v20 = vand.u32 4294901760, %v1157_v22 }
  0x78   : > { %1117 = vmatprep.subr.mxu1 %v1116_v21  ;;  %5740 = vst [vmem:[#allocation14_spill] sm:$0xff] %v4583_v11  ;;  %v1146_v21 = vand.u32 4294901760, %v1145_v45  ;;  %963 = vmatpush1.msra.mxu0 %v4577_v50 }
  0x79   : > { %1123 = vmatpush1.msra.mxu1 %v1122_v30  ;;  %v4590_v30 = vsub.f32 %v873_v27, %v4577_v50  ;;  %1254 = vmatprep.subr.mxu0 %v4426_v55 }
  0x7a   : > { %1129 = vmatprep.subr.mxu1 %v1128_v36  ;;  %v5667_v36 = vand.u32 4294901760, %v4583_v11 }
  0x7b   : > { %1135 = vmatpush1.msra.mxu1 %v1134_v42  ;;  %5741 = vst [vmem:[#allocation15_spill] sm:$0xff] %v4590_v30  ;;  %v5671_v37 = vand.u32 4294901760, %v4590_v30 }
  0x7c   : > { %1141 = vmatprep.subr.mxu1 %v1140_v52  ;;  %v1163_v42 = vsub.f32 %v4583_v11, %v5667_v36 }
  0x7d   : > { %1147 = vmatpush1.msra.mxu1 %v1146_v21  ;;  %v1169_v27 = vsub.f32 %v4590_v30, %v5671_v37 }
  0x7e   : > { %1153 = vmatprep.subr.mxu1 %v1152_v31  ;;  %v1164_v45 = vand.u32 4294901760, %v1163_v42 }
  0x7f   : > { %1159 = vmatpush1.msra.mxu1 %v1158_v20  ;;  %v1170_v52 = vand.u32 4294901760, %v1169_v27 }
  0x80   : > { %1165 = vmatprep.subr.mxu1 %v1164_v45 }
  0x81   : > { %1171 = vmatpush1.msra.mxu1 %v1170_v52 }
  0x82   : > { %1392 = vmatprep.subr.mxu1 %v4420_v51 }
  0xf2   : > { %v315_v1 = vpop.f32.mrf.mxu0 }
  0xf4   : > { %v3848_v21 = vpop.f32.mrf.mxu0 }
  0xf6   : > { %v325_v46 = vpop.f32.mrf.mxu0 }
  0xf8   : > { %v3851_v40 = vpop.f32.mrf.mxu0 }
  0xf9   : > { %v436_v22 = vpop.f32.mrf.mxu1 }
  0xfb   : > { %v3867_v31 = vpop.f32.mrf.mxu1  ;;  %v335_v25 = vpop.f32.mrf.mxu0 }
  0xfd   : > { %v442_v32 = vpop.f32.mrf.mxu1  ;;  %v3854_v20 = vpop.f32.mrf.mxu0 }
  0xff   : > { %v3870_v36 = vpop.f32.mrf.mxu1  ;;  %v345_v5 = vpop.f32.mrf.mxu0 }
 0x101   : > { %v448_v15 = vpop.f32.mrf.mxu1  ;;  %v3857_v37 = vpop.f32.mrf.mxu0 }
 0x102   : > { %v437_v37 = vadd.f32 %v436_v22, %v315_v1  ;;  %v449_v16 = vadd.f32 %v448_v15, %v335_v25 }
 0x103   : > { %v3873_v54 = vpop.f32.mrf.mxu1  ;;  %v355_v27 = vpop.f32.mrf.mxu0 }
 0x105   : > { %v454_v42 = vpop.f32.mrf.mxu1  ;;  %v3860_v52 = vpop.f32.mrf.mxu0 }
 0x107   : > { %v3876_v45 = vpop.f32.mrf.mxu1  ;;  %v536_v28 = vpop.f32.mrf.mxu0 }
 0x108   : > { %v537_v45 = vadd.f32 %v536_v28, %v437_v37  ;;  %v455_v28 = vadd.f32 %v454_v42, %v345_v5 }
 0x109   : > { %v460_v47 = vpop.f32.mrf.mxu1  ;;  %v3886_v21 = vpop.f32.mrf.mxu0 }
 0x10b   : > { %v3879_v33 = vpop.f32.mrf.mxu1  ;;  %v543_v18 = vpop.f32.mrf.mxu0 }
 0x10c   : > { %v443_v33 = vadd.f32 %v442_v32, %v325_v46 }
 0x10d   : > { %v639_v23 = vpop.f32.mrf.mxu1  ;;  %v3889_v40 = vpop.f32.mrf.mxu0 }
 0x10e   : > { %v640_v35 = vadd.f32 %v639_v23, %v537_v45  ;;  %v544_v26 = vadd.f32 %v543_v18, %v443_v33 }
 0x10f   : > { %v3905_v31 = vpop.f32.mrf.mxu1  ;;  %v550_v7 = vpop.f32.mrf.mxu0 }
 0x111   : > { %v647_v12 = vpop.f32.mrf.mxu1  ;;  %v3892_v20 = vpop.f32.mrf.mxu0 }
 0x112   : > { %v648_v51 = vadd.f32 %v647_v12, %v544_v26 }
 0x113   : > { %v3908_v36 = vpop.f32.mrf.mxu1  ;;  %v557_v61 = vpop.f32.mrf.mxu0 }
 0x114   : > { %v558_v37 = vadd.f32 %v557_v61, %v455_v28 }
 0x115   : > { %v655_v2 = vpop.f32.mrf.mxu1  ;;  %v3895_v0 = vpop.f32.mrf.mxu0 }
 0x117   : > { %v3911_v54 = vpop.f32.mrf.mxu1  ;;  %v564_v52 = vpop.f32.mrf.mxu0 }
 0x118   : > { %v551_v54 = vadd.f32 %v550_v7, %v449_v16  ;;  %v461_v7 = vadd.f32 %v460_v47, %v355_v27  ;;  %v5743_v16 = vmov 0.0  }
 0x119   : > { %v663_v55 = vpop.f32.mrf.mxu1  ;;  %v3898_v11 = vpop.f32.mrf.mxu0 }
 0x11a   : > { %v656_v11 = vadd.f32 %v655_v2, %v551_v54  ;;  %v664_v42 = vadd.f32 %v663_v55, %v558_v37  ;;  %v565_v45 = vadd.f32 %v564_v52, %v461_v7 }
 0x11b   : > { %v3914_v30 = vpop.f32.mrf.mxu1  ;;  %v748_v40 = vpop.f32.mrf.mxu0 }
 0x11c   : > { %v749_v6 = vadd.f32 %v748_v40, %v640_v35 }
 0x11d   : > { %v671_v21 = vpop.f32.mrf.mxu1  ;;  %v3924_v36 = vpop.f32.mrf.mxu0 }
 0x11f   : > { %v3917_v31 = vpop.f32.mrf.mxu1  ;;  %v754_v0 = vpop.f32.mrf.mxu0 }
 0x120   : > { %v755_v32 = vadd.f32 %v754_v0, %v648_v51 }
 0x121   : > { %v845_v20 = vpop.f32.mrf.mxu1  ;;  %v3927_v23 = vpop.f32.mrf.mxu0 }
 0x122   : > { %v846_v1 = vadd.f32 %v845_v20, %v749_v6 }
 0x123   : > { %v3943_v22 = vpop.f32.mrf.mxu1  ;;  %v760_v35 = vpop.f32.mrf.mxu0 }
 0x124   : > { %v893_v30 = vsel %vm891_vm3, %v846_v1, 0  ;;  %v761_v6 = vadd.f32 %v760_v35, %v656_v11  ;;  %v672_v22 = vadd.f32 %v671_v21, %v565_v45 }
 0x125   : > { %v4604_v46 = vand.u32 4294901760, %v893_v30  ;;  %v851_v18 = vpop.f32.mrf.mxu1  ;;  %v3930_v2 = vpop.f32.mrf.mxu0 }
 0x126   : > { %v852_v15 = vadd.f32 %v851_v18, %v755_v32 }
 0x127   : > { %v4607_v25 = vsub.f32 %v893_v30, %v4604_v46  ;;  %v3946_v12 = vpop.f32.mrf.mxu1  ;;  %1206 = vmatmul.mubr.f32.vlgmr.msra.gmra.mxu1 %v4604_v46  ;;  %v766_v27 = vpop.f32.mrf.mxu0 }
 0x128   : > { %v896_v5 = vsel %vm891_vm3, %v852_v15, 0  ;;  %1211 = vmatprep.mubr.f32.mxu1 %v5743_v16  ;;  %1394 = vmatpush1.msra.mxu1 %v4423_v53  ;;  %v767_v20 = vadd.f32 %v766_v27, %v664_v42 }
 0x129   : > { %5742 = vst [vmem:[#allocation16_spill] sm:$0xff] %v4607_v25  ;;  %v4614_v51 = vand.u32 4294901760, %v4607_v25  ;;  %v4616_v61 = vand.u32 4294901760, %v896_v5  ;;  %v857_v26 = vpop.f32.mrf.mxu1  ;;  %1396 = vmatprep.subr.mxu1 %v4428_v56  ;;  %v3933_v52 = vpop.f32.mrf.mxu0 }
 0x12a   : > { %v858_v33 = vadd.f32 %v857_v26, %v761_v6  ;;  %1398 = vmatpush1.msra.mxu1 %v4434_v59 }
 0x12b   : > { %v4621_v47 = vsub.f32 %v896_v5, %v4616_v61  ;;  %v3949_v31 = vpop.f32.mrf.mxu1  ;;  %1213 = vmatmul.mubr.f32.gmra.mxu1 %v4616_v61  ;;  %1400 = vmatprep.subr.mxu1 %v4441_v63  ;;  %v1000_v40 = vsub.f32 %v4607_v25, %v4614_v51  ;;  %v772_v32 = vpop.f32.mrf.mxu0 }
 0x12c   : > { %v899_v36 = vsel %vm891_vm3, %v858_v33, 0  ;;  %1218 = vmatprep.mubr.f32.mxu1 %v5743_v16  ;;  %1402 = vmatpush1.msra.mxu1 %v4448_v4  ;;  %v773_v37 = vadd.f32 %v772_v32, %v672_v22  ;;  %v5753_v22 = vld [vmem:[#allocation8_spill] sm:$0xff]  ;;  %v5755_v32 = vld [vmem:[#allocation11_spill] sm:$0xff] }
 0x12d   : > { %5744 = vst [vmem:[#allocation17_spill] sm:$0xff] %v4621_v47  ;;  %v4630_v55 = vand.u32 4294901760, %v899_v36  ;;  %v863_v54 = vpop.f32.mrf.mxu1  ;;  %v4632_v1 = vand.u32 4294901760, %v1000_v40  ;;  %1404 = vmatprep.subr.mxu1 %v4458_v9  ;;  %v4636_v0 = vand.u32 4294901760, %v4621_v47  ;;  %v3936_v15 = vpop.f32.mrf.mxu0 }
 0x12e   : > { %v864_v28 = vadd.f32 %v863_v54, %v767_v20  ;;  %1406 = vmatpush1.msra.mxu1 %v4468_v14  ;;  %v1796_v15 = vld [vmem:[#allocation2 + $0x110] sm:$0x1] }
 0x12f   : > { %5745 = vst [vmem:[#allocation18_spill] sm:$0xff] %v4636_v0  ;;  %v4640_v30 = vsub.f32 %v899_v36, %v4630_v55  ;;  %v3952_v23 = vpop.f32.mrf.mxu1  ;;  %1002 = vmatmul.mubr.f32.vlgmr.msra.gmra.mxu0 %v4632_v1  ;;  %1220 = vmatmul.mubr.f32.gmra.mxu1 %v4630_v55  ;;  %v1011_v18 = vsub.f32 %v4621_v47, %v4636_v0 }
 0x130   : > { %v902_v11 = vsel %vm891_vm3, %v864_v28, 0  ;;  %1257 = vmatpush1.msra.mxu0 %v4432_v58  ;;  %1408 = vmatprep.subr.mxu1 %v4491_v29  ;;  %v5754_v28 = vld [vmem:[#allocation10_spill] sm:$0xff]  ;;  %v1797_v23 = vld [vmem:[#allocation2 + $0x118] sm:$0x1] }
 0x131   : > { %5746 = vst [vmem:[#allocation19_spill] sm:$0xff] %v4640_v30  ;;  %v4649_v21 = vand.u32 4294901760, %v902_v11  ;;  %v869_v35 = vpop.f32.mrf.mxu1  ;;  %1007 = vmatprep.mubr.f32.mxu0 %v5743_v16  ;;  %1225 = vmatprep.mubr.f32.mxu1 %v5743_v16  ;;  %v4653_v12 = vand.u32 4294901760, %v1011_v18  ;;  %v4656_v7 = vand.u32 4294901760, %v4640_v30  ;;  %v5756_v18 = vld [vmem:[#allocation12_spill] sm:$0xff] }
 0x132   : > { %v870_v5 = vadd.f32 %v869_v35, %v773_v37  ;;  %1260 = vmatprep.subr.mxu0 %v4439_v62  ;;  %1410 = vmatpush1.msra.mxu1 %v4497_v34  ;;  %v1802_v37 = vsel %vm907_vm2, %v1797_v23, 0  ;;  %v5758_v35 = vld [vmem:[#allocation14_spill] sm:$0xff] }
 0x133   : > { %5747 = vst [vmem:[#allocation20_spill] sm:$0xff] %v4656_v7  ;;  %v4661_v6 = vsub.f32 %v902_v11, %v4649_v21  ;;  %v3955_v2 = vpop.f32.mrf.mxu1  ;;  %1013 = vmatmul.mubr.f32.gmra.mxu0 %v4653_v12  ;;  %1227 = vmatmul.mubr.f32.gmra.mxu1 %v4649_v21  ;;  %v1022_v26 = vsub.f32 %v4640_v30, %v4656_v7  ;;  %v5757_v11 = vld [vmem:[#allocation13_spill] sm:$0xff] }
 0x134   : > { %v905_v42 = vsel %vm891_vm3, %v870_v5, 0  ;;  %1263 = vmatpush1.msra.mxu0 %v4446_v3  ;;  %1412 = vmatprep.subr.mxu1 %v4505_v39  ;;  %v4732_v5 = vand.u32 4294901760, %v1802_v37 }
 0x135   : > { %5748 = vst [vmem:[#allocation21_spill] sm:$0xff] %v4661_v6  ;;  %v4670_v45 = vand.u32 4294901760, %v905_v42  ;;  %1266 = vmatprep.subr.mxu0 %v4456_v8  ;;  %1414 = vmatpush1.msra.mxu1 %v4514_v44  ;;  %v4674_v33 = vand.u32 4294901760, %v1022_v26  ;;  %v4677_v27 = vand.u32 4294901760, %v4661_v6  ;;  %v5762_v26 = vand.u32 4294901760, %v4432_v58 }
 0x136   : > { %1269 = vmatpush1.msra.mxu0 %v4466_v13  ;;  %1416 = vmatprep.subr.mxu1 %v4521_v49  ;;  %v5763_v58 = vand.u32 4294901760, %v4439_v62 }
 0x137   : > { %5749 = vst [vmem:[#allocation22_spill] sm:$0xff] %v4677_v27  ;;  %v4682_v31 = vsub.f32 %v905_v42, %v4670_v45  ;;  %1018 = vmatprep.mubr.f32.mxu0 %v5743_v16  ;;  %1232 = vmatprep.mubr.f32.mxu1 %v5743_v16  ;;  %v1033_v40 = vsub.f32 %v4661_v6, %v4677_v27 }
 0x138   : > { %1272 = vmatprep.subr.mxu0 %v4476_v19  ;;  %1418 = vmatpush1.msra.mxu1 %v4528_v60 }
 0x139   : > { %5750 = vst [vmem:[#allocation23_spill] sm:$0xff] %v4682_v31  ;;  %1024 = vmatmul.mubr.f32.gmra.mxu0 %v4674_v33  ;;  %1234 = vmatmul.mubr.f32.gmra.mxu1 %v4670_v45  ;;  %v4693_v36 = vand.u32 4294901760, %v4682_v31  ;;  %v4697_v20 = vand.u32 4294901760, %v1033_v40  ;;  %v1794_v40 = vld [vmem:[#allocation2 + $0x100] sm:$0xff] }
 0x13a   : > { %1275 = vmatpush1.msra.mxu0 %v4484_v24  ;;  %1420 = vmatprep.subr.mxu1 %v4538_v10 }
 0x13b   : > { %5751 = vst [vmem:[#allocation24_spill] sm:$0xff] %v4693_v36  ;;  %1278 = vmatprep.subr.mxu0 %v4503_v38  ;;  %1422 = vmatpush1.msra.mxu1 %v4548_v17  ;;  %v1044_v52 = vsub.f32 %v4682_v31, %v4693_v36 }
 0x13c   : > { %1281 = vmatpush1.msra.mxu0 %v4512_v43  ;;  %1424 = vmatprep.subr.mxu1 %v4571_v41 }
 0x13d   : > { %1029 = vmatprep.mubr.f32.mxu0 %v5743_v16  ;;  %1426 = vmatpush1.msra.mxu1 %v4577_v50  ;;  %v4711_v54 = vand.u32 4294901760, %v1044_v52  ;;  %v1793_v52 = vld [vmem:[#allocation2 + $0xf8] sm:$0xff] }
 0x13e   : > { %1459 = vmatprep.mubr.f32.mxu1 %v5743_v16  ;;  %1035 = vmatmul.mubr.f32.gmra.mxu0 %v4697_v20 }
 0x13f   : > { %1284 = vmatprep.subr.mxu0 %v4519_v48  ;;  %1463 = vmatmul.mubr.f32.vlgmr.msra.gmra.mxu1 %v4614_v51  ;;  %5752 = vst [vmem:[#allocation25_spill] sm:$0xff] %v4711_v54 }
 0x140   : > { %1287 = vmatpush1.msra.mxu0 %v4526_v57  ;;  %1670 = vmatprep.subr.mxu1 %v5753_v22 }
 0x141   : > { %1290 = vmatprep.subr.mxu0 %v5754_v28  ;;  %1040 = vmatprep.mubr.f32.mxu0 %v5743_v16 }
 0x142   : > { %1293 = vmatpush1.msra.mxu0 %v5755_v32  ;;  %1468 = vmatprep.mubr.f32.mxu1 %v5743_v16 }
 0x143   : > { %1672 = vmatpush1.msra.mxu1 %v4423_v53  ;;  %1046 = vmatmul.mubr.f32.gmra.mxu0 %v4711_v54  ;;  %v5759_v53 = vld [vmem:[#allocation15_spill] sm:$0xff] }
 0x144   : > { %1296 = vmatprep.subr.mxu0 %v5756_v18  ;;  %1472 = vmatmul.mubr.f32.gmra.mxu1 %v4636_v0 }
 0x145   : > { %1674 = vmatprep.subr.mxu1 %v4428_v56  ;;  %1299 = vmatpush1.msra.mxu0 %v5757_v11  ;;  %v1799_v56 = vsel %vm907_vm2, %v1796_v15, 0  ;;  %v5765_v15 = vand.u32 4294901760, %v4456_v8  ;;  %v5769_v8 = vand.u32 4294901760, %v4503_v38 }
 0x146   : > { %1676 = vmatpush1.msra.mxu1 %v4434_v59  ;;  %1302 = vmatprep.subr.mxu0 %v5758_v35  ;;  %v5760_v59 = vld [vmem:[#allocation9_spill] sm:$0xff]  ;;  %v4743_v42 = vand.u32 4294901760, %v1799_v56 }
 0x147   : > { %1678 = vmatprep.subr.mxu1 %v4441_v63  ;;  %1305 = vmatpush1.msra.mxu0 %v5759_v53  ;;  %v5761_v2 = vand.u32 4294901760, %v5760_v59  ;;  %v1795_v63 = vld [vmem:[#allocation2 + $0x108] sm:$0xff] }
 0x148   : > { %1338 = vmatprep.mubr.f32.mxu0 %v5743_v16  ;;  %1477 = vmatprep.mubr.f32.mxu1 %v5743_v16  ;;  %v4752_v22 = vand.u32 4294901760, %v1795_v63  ;;  %v4762_v23 = vsub.f32 %v1799_v56, %v4743_v42 }
 0x149   : > { %1680 = vmatpush1.msra.mxu1 %v4448_v4  ;;  %1341 = vmatmul.mubr.f32.vlgmr.msra.gmra.mxu0 %v4607_v25  ;;  %v4748_v4 = vsub.f32 %v1802_v37, %v4732_v5  ;;  %v5764_v37 = vand.u32 4294901760, %v4446_v3 }
 0x14a   : > { %1481 = vmatmul.mubr.f32.gmra.mxu1 %v4656_v7  ;;  %1520 = vmatprep.subr.mxu0 %v5761_v2  ;;  %v4774_v59 = vsub.f32 %v1795_v63, %v4752_v22  ;;  %v1790_v2 = vld [vmem:[#allocation2 + $0xe0] sm:$0xff] }
 0x14b   : > { %1682 = vmatprep.subr.mxu1 %v4458_v9  ;;  %1524 = vmatpush1.msra.mxu0 %v5762_v26  ;;  %v4757_v9 = vand.u32 4294901760, %v1794_v40  ;;  %v5697_v62 = vand.u32 4294901760, %v4748_v4  ;;  %v5766_v26 = vand.u32 4294901760, %v4466_v13  ;;  %v5767_v13 = vand.u32 4294901760, %v4476_v19  ;;  %v1787_v19 = vld [vmem:[#allocation2 + $0xc8] sm:$0xff] }
 0x14c   : > { %1684 = vmatpush1.msra.mxu1 %v4468_v14  ;;  %1346 = vmatprep.mubr.f32.mxu0 %v5743_v16  ;;  %v1792_v14 = vld [vmem:[#allocation2 + $0xf0] sm:$0xff] }
 0x14d   : > { %1686 = vmatprep.subr.mxu1 %v4491_v29  ;;  %1486 = vmatprep.mubr.f32.mxu1 %v5743_v16  ;;  %v4764_v29 = vand.u32 4294901760, %v1793_v52  ;;  %v4776_v56 = vand.u32 4294901760, %v1792_v14  ;;  %v4782_v3 = vsub.f32 %v1794_v40, %v4757_v9  ;;  %v4798_v40 = vand.u32 4294901760, %v1790_v2 }
 0x14e   : > { %1528 = vmatprep.subr.mxu0 %v5763_v58  ;;  %1688 = vmatpush1.msra.mxu1 %v4497_v34  ;;  %v1791_v34 = vld [vmem:[#allocation2 + $0xe8] sm:$0xff]  ;;  %v1788_v58 = vld [vmem:[#allocation2 + $0xd0] sm:$0xff] }
 0x14f   : > { %1349 = vmatmul.mubr.f32.gmra.mxu0 %v4621_v47  ;;  %1490 = vmatmul.mubr.f32.gmra.mxu1 %v4677_v27  ;;  %v4790_v63 = vand.u32 4294901760, %v1791_v34  ;;  %v4828_v38 = vsub.f32 %v1790_v2, %v4798_v40  ;;  %v5773_v2 = vand.u32 4294901760, %v4782_v3  ;;  %v1783_v27 = vld [vmem:[#allocation2 + $0xa8] sm:$0xff] }
 0x150   : > { %1532 = vmatpush1.msra.mxu0 %v5764_v37  ;;  %1690 = vmatprep.subr.mxu1 %v4505_v39  ;;  %v1789_v39 = vld [vmem:[#allocation2 + $0xd8] sm:$0xff]  ;;  %v4804_v37 = vsub.f32 %v1792_v14, %v4776_v56  ;;  %v5770_v14 = vand.u32 4294901760, %v4762_v23  ;;  %v4885_v7 = vand.u32 4294901760, %v1783_v27 }
 0x151   : > { %1536 = vmatprep.subr.mxu0 %v5765_v15  ;;  %1692 = vmatpush1.msra.mxu1 %v4514_v44  ;;  %v4788_v44 = vsub.f32 %v1793_v52, %v4764_v29  ;;  %v4806_v15 = vand.u32 4294901760, %v1789_v39 }
 0x152   : > { %1540 = vmatpush1.msra.mxu0 %v5766_v26  ;;  %1694 = vmatprep.subr.mxu1 %v4521_v49  ;;  %v1959_v49 = vsub.f32 %v4748_v4, %v5697_v62  ;;  %v1786_v62 = vld [vmem:[#allocation2 + $0xc0] sm:$0xff]  ;;  %v1965_v52 = vsub.f32 %v4762_v23, %v5770_v14  ;;  %v5774_v14 = vand.u32 4294901760, %v4519_v48 }
 0x153   : > { %1354 = vmatprep.mubr.f32.mxu0 %v5743_v16  ;;  %1495 = vmatprep.mubr.f32.mxu1 %v5743_v16 }
 0x154   : > { %1544 = vmatprep.subr.mxu0 %v5767_v13  ;;  %1696 = vmatpush1.msra.mxu1 %v4528_v60  ;;  %v5768_v60 = vand.u32 4294901760, %v4484_v24  ;;  %v4812_v13 = vand.u32 4294901760, %v1788_v58  ;;  %v4822_v24 = vsub.f32 %v1791_v34, %v4790_v63  ;;  %v1960_v26 = vand.u32 4294901760, %v1959_v49  ;;  %v1784_v49 = vld [vmem:[#allocation2 + $0xb0] sm:$0xff] }
 0x155   : > { %1357 = vmatmul.mubr.f32.gmra.mxu0 %v4640_v30  ;;  %1499 = vmatmul.mubr.f32.gmra.mxu1 %v4693_v36  ;;  %v5708_v36 = vand.u32 4294901760, %v4788_v44  ;;  %v4866_v48 = vand.u32 4294901760, %v1784_v49 }
 0x156   : > { %1548 = vmatpush1.msra.mxu0 %v5768_v60  ;;  %1698 = vmatprep.subr.mxu1 %v4538_v10  ;;  %v1785_v10 = vld [vmem:[#allocation2 + $0xb8] sm:$0xff]  ;;  %v5771_v60 = vand.u32 4294901760, %v4512_v43  ;;  %v4839_v43 = vsub.f32 %v1789_v39, %v4806_v15  ;;  %v1966_v39 = vand.u32 4294901760, %v1965_v52  ;;  %v5776_v52 = vand.u32 4294901760, %v5754_v28 }
 0x157   : > { %1552 = vmatprep.subr.mxu0 %v5769_v8  ;;  %1700 = vmatpush1.msra.mxu1 %v4548_v17  ;;  %v4830_v17 = vand.u32 4294901760, %v1787_v19  ;;  %v5772_v8 = vand.u32 4294901760, %v4774_v59  ;;  %v1983_v30 = vsub.f32 %v4788_v44, %v5708_v36 }
 0x158   : > { %1556 = vmatpush1.msra.mxu0 %v5771_v60  ;;  %1702 = vmatprep.subr.mxu1 %v4571_v41  ;;  %v4841_v41 = vand.u32 4294901760, %v1786_v62  ;;  %v4849_v60 = vsub.f32 %v1788_v58, %v4812_v13  ;;  %v5778_v58 = vand.u32 4294901760, %v5755_v32 }
 0x159   : > { %1362 = vmatprep.mubr.f32.mxu0 %v5743_v16  ;;  %1704 = vmatpush1.msra.mxu1 %v4577_v50  ;;  %v1971_v34 = vsub.f32 %v4774_v59, %v5772_v8  ;;  %v1977_v50 = vsub.f32 %v4782_v3, %v5773_v2  ;;  %v4851_v8 = vand.u32 4294901760, %v1785_v10  ;;  %v5775_v2 = vand.u32 4294901760, %v4526_v57 }
 0x15a   : > { %1737 = vmatprep.mubr.f32.mxu1 %v5743_v16  ;;  %1365 = vmatmul.mubr.f32.gmra.mxu0 %v4661_v6  ;;  %v4864_v47 = vsub.f32 %v1787_v19, %v4830_v17  ;;  %v5777_v6 = vand.u32 4294901760, %v4804_v37  ;;  %v1781_v19 = vld [vmem:[#allocation2 + $0x98] sm:$0xff] }
 0x15b   : > { %1560 = vmatprep.subr.mxu0 %v5774_v14  ;;  %1739 = vmatmul.mubr.f32.vlgmr.msra.gmra.mxu1 %v4604_v46  ;;  %v1782_v14 = vld [vmem:[#allocation2 + $0xa0] sm:$0xff]  ;;  %v1972_v36 = vand.u32 4294901760, %v1971_v34  ;;  %v1978_v28 = vand.u32 4294901760, %v1977_v50  ;;  %v4883_v34 = vsub.f32 %v1785_v10, %v4851_v8  ;;  %v5780_v50 = vand.u32 4294901760, %v5756_v18 }
 0x15c   : > { %1564 = vmatpush1.msra.mxu0 %v5775_v2  ;;  %1961 = vmatprep.subr.mxu1 %v1960_v26  ;;  %v1989_v57 = vsub.f32 %v4804_v37, %v5777_v6  ;;  %v4876_v2 = vsub.f32 %v1786_v62, %v4841_v41  ;;  %v1780_v6 = vld [vmem:[#allocation2 + $0x90] sm:$0xff]  ;;  %v1984_v62 = vand.u32 4294901760, %v1983_v30  ;;  %v5779_v26 = vand.u32 4294901760, %v4822_v24 }
 0x15d   : > { %1568 = vmatprep.subr.mxu0 %v5776_v52  ;;  %1370 = vmatprep.mubr.f32.mxu0 %v5743_v16  ;;  %v5781_v10 = vand.u32 4294901760, %v4828_v38  ;;  %v4903_v30 = vand.u32 4294901760, %v1781_v19  ;;  %v5783_v18 = vand.u32 4294901760, %v4839_v43  ;;  %v4911_v54 = vand.u32 4294901760, %v1780_v6 }
 0x15e   : > { %1572 = vmatpush1.msra.mxu0 %v5778_v58  ;;  %1744 = vmatprep.mubr.f32.mxu1 %v5743_v16  ;;  %v1995_v32 = vsub.f32 %v4822_v24, %v5779_v26  ;;  %v4891_v58 = vand.u32 4294901760, %v1782_v14  ;;  %v5782_v26 = vand.u32 4294901760, %v5757_v11  ;;  %v1990_v25 = vand.u32 4294901760, %v1989_v57 }
 0x15f   : > { %1967 = vmatpush1.msra.mxu1 %v1966_v39  ;;  %1373 = vmatmul.mubr.f32.gmra.mxu0 %v4682_v31  ;;  %v2001_v52 = vsub.f32 %v4828_v38, %v5781_v10  ;;  %v5726_v39 = vand.u32 4294901760, %v4864_v47  ;;  %v4901_v31 = vsub.f32 %v1784_v49, %v4866_v48  ;;  %v5784_v10 = vand.u32 4294901760, %v5758_v35 }
 0x160   : > { %1576 = vmatprep.subr.mxu0 %v5780_v50  ;;  %1746 = vmatmul.mubr.f32.gmra.mxu1 %v4616_v61  ;;  %v2007_v50 = vsub.f32 %v4839_v43, %v5783_v18  ;;  %v5785_v49 = vand.u32 4294901760, %v4849_v60  ;;  %v5725_v11 = vand.u32 4294901760, %v4883_v34  ;;  %v4920_v57 = vsub.f32 %v1783_v27, %v4885_v7 }
 0x161   : > { %1973 = vmatprep.subr.mxu1 %v1972_v36  ;;  %1580 = vmatpush1.msra.mxu0 %v5782_v26  ;;  %v5786_v26 = vand.u32 4294901760, %v5759_v53  ;;  %v1996_v18 = vand.u32 4294901760, %v1995_v32  ;;  %v4925_v0 = vsub.f32 %v1782_v14, %v4891_v58  ;;  %v2002_v35 = vand.u32 4294901760, %v2001_v52 }
 0x162   : > { %1979 = vmatpush1.msra.mxu1 %v1978_v28  ;;  %1584 = vmatprep.subr.mxu0 %v5784_v10  ;;  %v2013_v36 = vsub.f32 %v4849_v60, %v5785_v49  ;;  %v2019_v28 = vsub.f32 %v4864_v47, %v5726_v39  ;;  %v5724_v27 = vand.u32 4294901760, %v4901_v31  ;;  %v2008_v53 = vand.u32 4294901760, %v2007_v50 }
 0x163   : > { %1985 = vmatprep.subr.mxu1 %v1984_v62  ;;  %1588 = vmatpush1.msra.mxu0 %v5786_v26  ;;  %v4934_v62 = vsub.f32 %v1781_v19, %v4903_v30  ;;  %v5787_v14 = vand.u32 4294901760, %v4876_v2  ;;  %v4941_v10 = vsub.f32 %v1780_v6, %v4911_v54  ;;  %v2031_v19 = vsub.f32 %v4883_v34, %v5725_v11 }
 0x164   : > { %1621 = vmatprep.mubr.f32.mxu0 %v5743_v16  ;;  %1751 = vmatprep.mubr.f32.mxu1 %v5743_v16  ;;  %v2014_v52 = vand.u32 4294901760, %v2013_v36  ;;  %v5721_v50 = vand.u32 4294901760, %v4925_v0  ;;  %v2020_v6 = vand.u32 4294901760, %v2019_v28  ;;  %v2037_v49 = vsub.f32 %v4901_v31, %v5724_v27  ;;  %v2725_v27 = vld [vmem:[#allocation2 + $0x150] sm:$0xff] }
 0x165   : > { %1991 = vmatpush1.msra.mxu1 %v1990_v25  ;;  %1623 = vmatmul.mubr.f32.vlgmr.msra.gmra.mxu0 %v4604_v46  ;;  %v2025_v32 = vsub.f32 %v4876_v2, %v5787_v14  ;;  %v5722_v25 = vand.u32 4294901760, %v4920_v57  ;;  %v5720_v36 = vand.u32 4294901760, %v4934_v62  ;;  %v2032_v14 = vand.u32 4294901760, %v2031_v19 }
 0x166   : > { %1753 = vmatmul.mubr.f32.gmra.mxu1 %v4630_v55  ;;  %1819 = vmatprep.subr.mxu0 %v4732_v5  ;;  %v2049_v28 = vsub.f32 %v4925_v0, %v5721_v50  ;;  %v5804_v11 = vand.u32 4294901760, %v4839_v43 }
 0x167   : > { %1997 = vmatprep.subr.mxu1 %v1996_v18  ;;  %1821 = vmatpush1.msra.mxu0 %v4743_v42  ;;  %v2026_v26 = vand.u32 4294901760, %v2025_v32  ;;  %v5719_v18 = vand.u32 4294901760, %v4941_v10  ;;  %v2055_v32 = vsub.f32 %v4934_v62, %v5720_v36  ;;  %v5799_v36 = vand.u32 4294901760, %v4804_v37 }
 0x168   : > { %2003 = vmatpush1.msra.mxu1 %v2002_v35  ;;  %1628 = vmatprep.mubr.f32.mxu0 %v5743_v16  ;;  %v2043_v35 = vsub.f32 %v4920_v57, %v5722_v25 }
 0x169   : > { %2009 = vmatprep.subr.mxu1 %v2008_v53  ;;  %1758 = vmatprep.mubr.f32.mxu1 %v5743_v16  ;;  %v2038_v53 = vand.u32 4294901760, %v2037_v49  ;;  %v2056_v49 = vand.u32 4294901760, %v2055_v32  ;;  %v5790_v32 = vld [vmem:[#allocation16_spill] sm:$0xff] }
 0x16a   : > { %1823 = vmatprep.subr.mxu0 %v4752_v22  ;;  %2015 = vmatpush1.msra.mxu1 %v2014_v52  ;;  %v2061_v52 = vsub.f32 %v4941_v10, %v5719_v18  ;;  %v2044_v19 = vand.u32 4294901760, %v2043_v35  ;;  %v5788_v35 = vld [vmem:[#allocation25_spill] sm:$0xff]  ;;  %v2729_v18 = vld [vmem:[#allocation2 + $0x170] sm:$0xff] }
 0x16b   : > { %1630 = vmatmul.mubr.f32.gmra.mxu0 %v4616_v61  ;;  %1760 = vmatmul.mubr.f32.gmra.mxu1 %v4649_v21 }
 0x16c   : > { %1825 = vmatpush1.msra.mxu0 %v4757_v9  ;;  %2021 = vmatprep.subr.mxu1 %v2020_v6  ;;  %v2050_v6 = vand.u32 4294901760, %v2049_v28  ;;  %v5789_v28 = vld [vmem:[#allocation18_spill] sm:$0xff] }
 0x16d   : > { %1827 = vmatprep.subr.mxu0 %v4764_v29  ;;  %2027 = vmatpush1.msra.mxu1 %v2026_v26  ;;  %v2062_v26 = vand.u32 4294901760, %v2061_v52  ;;  %v5791_v52 = vld [vmem:[#allocation20_spill] sm:$0xff] }
 0x16e   : > { %1829 = vmatpush1.msra.mxu0 %v4776_v56  ;;  %2033 = vmatprep.subr.mxu1 %v2032_v14  ;;  %v2736_v14 = vld [vmem:[#allocation2 + $0x1a8] sm:$0x1] }
 0x16f   : > { %1635 = vmatprep.mubr.f32.mxu0 %v5743_v16  ;;  %1765 = vmatprep.mubr.f32.mxu1 %v5743_v16 }
 0x170   : > { %1831 = vmatprep.subr.mxu0 %v4790_v63  ;;  %2039 = vmatpush1.msra.mxu1 %v2038_v53  ;;  %v2735_v53 = vld [vmem:[#allocation2 + $0x1a0] sm:$0x1] }
 0x171   : > { %1637 = vmatmul.mubr.f32.gmra.mxu0 %v4630_v55  ;;  %1767 = vmatmul.mubr.f32.gmra.mxu1 %v4670_v45 }
 0x172   : > { %1833 = vmatpush1.msra.mxu0 %v4798_v40  ;;  %2045 = vmatprep.subr.mxu1 %v2044_v19  ;;  %v5793_v19 = vand.u32 4294901760, %v4762_v23 }
 0x173   : > { %1835 = vmatprep.subr.mxu0 %v4806_v15  ;;  %2051 = vmatpush1.msra.mxu1 %v2050_v6 }
 0x174   : > { %1837 = vmatpush1.msra.mxu0 %v4812_v13  ;;  %2057 = vmatprep.subr.mxu1 %v2056_v49  ;;  %v2733_v49 = vld [vmem:[#allocation2 + $0x190] sm:$0xff] }
 0x175   : > { %1642 = vmatprep.mubr.f32.mxu0 %v5743_v16  ;;  %2063 = vmatpush1.msra.mxu1 %v2062_v26  ;;  %v2732_v26 = vld [vmem:[#allocation2 + $0x188] sm:$0xff] }
 0x176   : > { %2096 = vmatprep.mubr.f32.mxu1 %v5743_v16  ;;  %1644 = vmatmul.mubr.f32.gmra.mxu0 %v4649_v21 }
 0x177   : > { %1839 = vmatprep.subr.mxu0 %v4830_v17  ;;  %2098 = vmatmul.mubr.f32.vlgmr.msra.gmra.mxu1 %v4604_v46 }
 0x178   : > { %1841 = vmatpush1.msra.mxu0 %v4841_v41  ;;  %2288 = vmatprep.subr.mxu1 %v4732_v5 }
 0x179   : > { %1843 = vmatprep.subr.mxu0 %v4851_v8  ;;  %1649 = vmatprep.mubr.f32.mxu0 %v5743_v16 }
 0x17a   : > { %1845 = vmatpush1.msra.mxu0 %v4866_v48  ;;  %2103 = vmatprep.mubr.f32.mxu1 %v5743_v16 }
 0x17b   : > { %2290 = vmatpush1.msra.mxu1 %v4743_v42  ;;  %1651 = vmatmul.mubr.f32.gmra.mxu0 %v4670_v45 }
 0x17c   : > { %1847 = vmatprep.subr.mxu0 %v4885_v7  ;;  %2105 = vmatmul.mubr.f32.gmra.mxu1 %v4616_v61 }
 0x17d   : > { %2292 = vmatprep.subr.mxu1 %v4752_v22  ;;  %1849 = vmatpush1.msra.mxu0 %v4891_v58 }
 0x17e   : > { %2294 = vmatpush1.msra.mxu1 %v4757_v9  ;;  %1851 = vmatprep.subr.mxu0 %v4903_v30 }
 0x17f   : > { %2296 = vmatprep.subr.mxu1 %v4764_v29  ;;  %1853 = vmatpush1.msra.mxu0 %v4911_v54 }
 0x180   : > { %1886 = vmatprep.mubr.f32.mxu0 %v5743_v16  ;;  %2110 = vmatprep.mubr.f32.mxu1 %v5743_v16 }
 0x181   : > { %2298 = vmatpush1.msra.mxu1 %v4776_v56  ;;  %1892 = vmatmul.mubr.f32.vlgmr.msra.gmra.mxu0 %v4632_v1 }
 0x182   : > { %2112 = vmatmul.mubr.f32.gmra.mxu1 %v4630_v55  ;;  %2148 = vmatprep.subr.mxu0 %v4748_v4 }
 0x183   : > { %2300 = vmatprep.subr.mxu1 %v4790_v63  ;;  %2151 = vmatpush1.msra.mxu0 %v4762_v23  ;;  %v5794_v23 = vand.u32 4294901760, %v4774_v59 }
 0x184   : > { %2302 = vmatpush1.msra.mxu1 %v4798_v40  ;;  %1897 = vmatprep.mubr.f32.mxu0 %v5743_v16 }
 0x185   : > { %2304 = vmatprep.subr.mxu1 %v4806_v15  ;;  %2117 = vmatprep.mubr.f32.mxu1 %v5743_v16 }
 0x186   : > { %2154 = vmatprep.subr.mxu0 %v4774_v59  ;;  %2306 = vmatpush1.msra.mxu1 %v4812_v13 }
 0x187   : > { %1903 = vmatmul.mubr.f32.gmra.mxu0 %v4653_v12  ;;  %2119 = vmatmul.mubr.f32.gmra.mxu1 %v4649_v21 }
 0x188   : > { %2157 = vmatpush1.msra.mxu0 %v4782_v3  ;;  %2308 = vmatprep.subr.mxu1 %v4830_v17 }
 0x189   : > { %2160 = vmatprep.subr.mxu0 %v4788_v44  ;;  %2310 = vmatpush1.msra.mxu1 %v4841_v41 }
 0x18a   : > { %2163 = vmatpush1.msra.mxu0 %v4804_v37  ;;  %2312 = vmatprep.subr.mxu1 %v4851_v8  ;;  %v5800_v37 = vand.u32 4294901760, %v4822_v24 }
 0x18b   : > { %1908 = vmatprep.mubr.f32.mxu0 %v5743_v16  ;;  %2124 = vmatprep.mubr.f32.mxu1 %v5743_v16 }
 0x18c   : > { %2166 = vmatprep.subr.mxu0 %v4822_v24  ;;  %2314 = vmatpush1.msra.mxu1 %v4866_v48  ;;  %v2726_v24 = vld [vmem:[#allocation2 + $0x158] sm:$0xff] }
 0x18d   : > { %1914 = vmatmul.mubr.f32.gmra.mxu0 %v4674_v33  ;;  %2126 = vmatmul.mubr.f32.gmra.mxu1 %v4670_v45 }
 0x18e   : > { %2169 = vmatpush1.msra.mxu0 %v4828_v38  ;;  %2316 = vmatprep.subr.mxu1 %v4885_v7 }
 0x18f   : > { %2172 = vmatprep.subr.mxu0 %v4839_v43  ;;  %2318 = vmatpush1.msra.mxu1 %v4891_v58 }
 0x190   : > { %2175 = vmatpush1.msra.mxu0 %v4849_v60  ;;  %2320 = vmatprep.subr.mxu1 %v4903_v30 }
 0x191   : > { %1919 = vmatprep.mubr.f32.mxu0 %v5743_v16  ;;  %2322 = vmatpush1.msra.mxu1 %v4911_v54 }
 0x192   : > { %2355 = vmatprep.mubr.f32.mxu1 %v5743_v16  ;;  %1925 = vmatmul.mubr.f32.gmra.mxu0 %v4697_v20 }
 0x193   : > { %2178 = vmatprep.subr.mxu0 %v4864_v47  ;;  %2359 = vmatmul.mubr.f32.vlgmr.msra.gmra.mxu1 %v4614_v51 }
 0x194   : > { %2181 = vmatpush1.msra.mxu0 %v4876_v2  ;;  %2570 = vmatprep.subr.mxu1 %v4732_v5  ;;  %v2741_v5 = vsel %vm907_vm2, %v2736_v14, 0  ;;  %v5795_v14 = vld [vmem:[#allocation17_spill] sm:$0xff] }
 0x195   : > { %2184 = vmatprep.subr.mxu0 %v4883_v34  ;;  %1930 = vmatprep.mubr.f32.mxu0 %v5743_v16 }
 0x196   : > { %2187 = vmatpush1.msra.mxu0 %v4901_v31  ;;  %2364 = vmatprep.mubr.f32.mxu1 %v5743_v16 }
 0x197   : > { %2572 = vmatpush1.msra.mxu1 %v4743_v42  ;;  %1936 = vmatmul.mubr.f32.gmra.mxu0 %v5788_v35  ;;  %v5064_v42 = vand.u32 4294901760, %v2741_v5 }
 0x198   : > { %2190 = vmatprep.subr.mxu0 %v4920_v57  ;;  %2368 = vmatmul.mubr.f32.gmra.mxu1 %v5789_v28 }
 0x199   : > { %2574 = vmatprep.subr.mxu1 %v4752_v22  ;;  %2193 = vmatpush1.msra.mxu0 %v4925_v0  ;;  %v2738_v22 = vsel %vm907_vm2, %v2735_v53, 0  ;;  %v5796_v53 = vld [vmem:[#allocation22_spill] sm:$0xff] }
 0x19a   : > { %2576 = vmatpush1.msra.mxu1 %v4757_v9  ;;  %2196 = vmatprep.subr.mxu0 %v4934_v62  ;;  %v5792_v9 = vand.u32 4294901760, %v4748_v4  ;;  %v5075_v6 = vand.u32 4294901760, %v2738_v22 }
 0x19b   : > { %2578 = vmatprep.subr.mxu1 %v4764_v29  ;;  %2199 = vmatpush1.msra.mxu0 %v4941_v10  ;;  %v2734_v29 = vld [vmem:[#allocation2 + $0x198] sm:$0xff] }
 0x19c   : > { %2232 = vmatprep.mubr.f32.mxu0 %v5743_v16  ;;  %2373 = vmatprep.mubr.f32.mxu1 %v5743_v16  ;;  %v5084_v4 = vand.u32 4294901760, %v2734_v29 }
 0x19d   : > { %2580 = vmatpush1.msra.mxu1 %v4776_v56  ;;  %2235 = vmatmul.mubr.f32.vlgmr.msra.gmra.mxu0 %v5790_v32  ;;  %v5080_v56 = vsub.f32 %v2741_v5, %v5064_v42  ;;  %v5094_v5 = vsub.f32 %v2738_v22, %v5075_v6 }
 0x19e   : > { %2377 = vmatmul.mubr.f32.gmra.mxu1 %v5791_v52  ;;  %2418 = vmatprep.subr.mxu0 %v5792_v9  ;;  %v5797_v9 = vand.u32 4294901760, %v4782_v3 }
 0x19f   : > { %2582 = vmatprep.subr.mxu1 %v4790_v63  ;;  %2422 = vmatpush1.msra.mxu0 %v5793_v19  ;;  %v5089_v63 = vand.u32 4294901760, %v2733_v49  ;;  %v5723_v59 = vand.u32 4294901760, %v5080_v56  ;;  %v5798_v19 = vand.u32 4294901760, %v4788_v44  ;;  %v5727_v44 = vand.u32 4294901760, %v5094_v5 }
 0x1a0   : > { %2584 = vmatpush1.msra.mxu1 %v4798_v40  ;;  %2240 = vmatprep.mubr.f32.mxu0 %v5743_v16  ;;  %v2731_v40 = vld [vmem:[#allocation2 + $0x180] sm:$0xff] }
 0x1a1   : > { %2586 = vmatprep.subr.mxu1 %v4806_v15  ;;  %2382 = vmatprep.mubr.f32.mxu1 %v5743_v16  ;;  %v5096_v15 = vand.u32 4294901760, %v2732_v26  ;;  %v5108_v22 = vand.u32 4294901760, %v2731_v40  ;;  %v5114_v3 = vsub.f32 %v2733_v49, %v5089_v63  ;;  %v5801_v49 = vld [vmem:[#allocation19_spill] sm:$0xff] }
 0x1a2   : > { %2426 = vmatprep.subr.mxu0 %v5794_v23  ;;  %2588 = vmatpush1.msra.mxu1 %v4812_v13  ;;  %v2730_v13 = vld [vmem:[#allocation2 + $0x178] sm:$0xff]  ;;  %v5106_v23 = vsub.f32 %v2734_v29, %v5084_v4 }
 0x1a3   : > { %2243 = vmatmul.mubr.f32.gmra.mxu0 %v5795_v14  ;;  %2386 = vmatmul.mubr.f32.gmra.mxu1 %v5796_v53  ;;  %v5122_v29 = vand.u32 4294901760, %v2730_v13  ;;  %v5136_v50 = vsub.f32 %v2731_v40, %v5108_v22  ;;  %v2904_v40 = vsub.f32 %v5094_v5, %v5727_v44 }
 0x1a4   : > { %2430 = vmatpush1.msra.mxu0 %v5797_v9  ;;  %2590 = vmatprep.subr.mxu1 %v4830_v17  ;;  %v2728_v17 = vld [vmem:[#allocation2 + $0x168] sm:$0xff]  ;;  %v2727_v9 = vld [vmem:[#allocation2 + $0x160] sm:$0xff] }
 0x1a5   : > { %2434 = vmatprep.subr.mxu0 %v5798_v19  ;;  %2592 = vmatpush1.msra.mxu1 %v4841_v41  ;;  %v5120_v41 = vsub.f32 %v2732_v26, %v5096_v15  ;;  %v5802_v19 = vld [vmem:[#allocation24_spill] sm:$0xff]  ;;  %v5728_v26 = vand.u32 4294901760, %v5106_v23  ;;  %v5138_v25 = vand.u32 4294901760, %v2728_v17 }
 0x1a6   : > { %2438 = vmatpush1.msra.mxu0 %v5799_v36  ;;  %2594 = vmatprep.subr.mxu1 %v4851_v8  ;;  %v2898_v8 = vsub.f32 %v5080_v56, %v5723_v59  ;;  %v5130_v36 = vand.u32 4294901760, %v2729_v18  ;;  %v5144_v59 = vand.u32 4294901760, %v2727_v9 }
 0x1a7   : > { %2248 = vmatprep.mubr.f32.mxu0 %v5743_v16  ;;  %2391 = vmatprep.mubr.f32.mxu1 %v5743_v16  ;;  %v5729_v39 = vand.u32 4294901760, %v5120_v41 }
 0x1a8   : > { %2442 = vmatprep.subr.mxu0 %v5800_v37  ;;  %2596 = vmatpush1.msra.mxu1 %v4866_v48  ;;  %v5803_v48 = vand.u32 4294901760, %v4828_v38  ;;  %v5154_v38 = vsub.f32 %v2730_v13, %v5122_v29  ;;  %v2899_v37 = vand.u32 4294901760, %v2898_v8  ;;  %v5160_v43 = vsub.f32 %v2729_v18, %v5130_v36  ;;  %v2723_v8 = vld [vmem:[#allocation2 + $0x140] sm:$0xff]  ;;  %v5806_v18 = vld [vmem:[#allocation21_spill] sm:$0xff] }
 0x1a9   : > { %2251 = vmatmul.mubr.f32.gmra.mxu0 %v5801_v49  ;;  %2395 = vmatmul.mubr.f32.gmra.mxu1 %v5802_v19  ;;  %v5181_v44 = vsub.f32 %v2727_v9, %v5144_v59  ;;  %v5808_v13 = vand.u32 4294901760, %v4864_v47  ;;  %v2922_v19 = vsub.f32 %v5120_v41, %v5729_v39  ;;  %v2722_v49 = vld [vmem:[#allocation2 + $0x138] sm:$0xff]  ;;  %v5198_v47 = vand.u32 4294901760, %v2723_v8 }
 0x1aa   : > { %2446 = vmatpush1.msra.mxu0 %v5803_v48  ;;  %2598 = vmatprep.subr.mxu1 %v4885_v7  ;;  %v2724_v7 = vld [vmem:[#allocation2 + $0x148] sm:$0xff]  ;;  %v5805_v48 = vand.u32 4294901760, %v4849_v60  ;;  %v5171_v60 = vsub.f32 %v2728_v17, %v5138_v25  ;;  %v2905_v17 = vand.u32 4294901760, %v2904_v40  ;;  %v5810_v40 = vand.u32 4294901760, %v4883_v34 }
 0x1ab   : > { %2450 = vmatprep.subr.mxu0 %v5804_v11  ;;  %2600 = vmatpush1.msra.mxu1 %v4891_v58  ;;  %v5162_v58 = vand.u32 4294901760, %v2726_v24  ;;  %v2910_v11 = vsub.f32 %v5106_v23, %v5728_v26  ;;  %v5183_v26 = vand.u32 4294901760, %v2724_v7  ;;  %v5812_v9 = vand.u32 4294901760, %v4901_v31 }
 0x1ac   : > { %2454 = vmatpush1.msra.mxu0 %v5805_v48  ;;  %2602 = vmatprep.subr.mxu1 %v4903_v30  ;;  %v5173_v30 = vand.u32 4294901760, %v2725_v27  ;;  %v5807_v48 = vand.u32 4294901760, %v5114_v3  ;;  %v5217_v14 = vand.u32 4294901760, %v2722_v49  ;;  %v5814_v52 = vand.u32 4294901760, %v5154_v38 }
 0x1ad   : > { %2256 = vmatprep.mubr.f32.mxu0 %v5743_v16  ;;  %2604 = vmatpush1.msra.mxu1 %v4911_v54  ;;  %v5196_v53 = vsub.f32 %v2726_v24, %v5162_v58  ;;  %v2911_v39 = vand.u32 4294901760, %v2910_v11  ;;  %v2720_v24 = vld [vmem:[#allocation2 + $0x128] sm:$0xff]  ;;  %v5215_v11 = vsub.f32 %v2724_v7, %v5183_v26  ;;  %v5816_v7 = vand.u32 4294901760, %v5160_v43 }
 0x1ae   : > { %2637 = vmatprep.mubr.f32.mxu1 %v5743_v16  ;;  %2259 = vmatmul.mubr.f32.gmra.mxu0 %v5806_v18  ;;  %v2916_v54 = vsub.f32 %v5114_v3, %v5807_v48  ;;  %v5809_v48 = vand.u32 4294901760, %v4876_v2  ;;  %v5811_v18 = vand.u32 4294901760, %v5136_v50  ;;  %v2934_v31 = vsub.f32 %v5154_v38, %v5814_v52 }
 0x1af   : > { %2458 = vmatprep.subr.mxu0 %v5808_v13  ;;  %2639 = vmatmul.mubr.f32.vlgmr.msra.gmra.mxu1 %v4604_v46  ;;  %v2721_v13 = vld [vmem:[#allocation2 + $0x130] sm:$0xff]  ;;  %v5817_v52 = vand.u32 4294901760, %v4925_v0  ;;  %v2969_v0 = vand.u32 4294901760, %v5215_v11 }
 0x1b0   : > { %2462 = vmatpush1.msra.mxu0 %v5809_v48  ;;  %2900 = vmatprep.subr.mxu1 %v2899_v37  ;;  %v2928_v2 = vsub.f32 %v5136_v50, %v5811_v18  ;;  %v5208_v48 = vsub.f32 %v2725_v27, %v5173_v30  ;;  %v2917_v34 = vand.u32 4294901760, %v2916_v54  ;;  %v2719_v18 = vld [vmem:[#allocation2 + $0x120] sm:$0xff]  ;;  %v5813_v37 = vld [vmem:[#allocation23_spill] sm:$0xff]  ;;  %v2923_v27 = vand.u32 4294901760, %v2922_v19 }
 0x1b1   : > { %2466 = vmatprep.subr.mxu0 %v5810_v40  ;;  %2264 = vmatprep.mubr.f32.mxu0 %v5743_v16  ;;  %v5815_v54 = vand.u32 4294901760, %v4920_v57  ;;  %v2940_v40 = vsub.f32 %v5160_v43, %v5816_v7  ;;  %v5235_v19 = vand.u32 4294901760, %v2720_v24  ;;  %v5818_v57 = vand.u32 4294901760, %v5171_v60 }
 0x1b2   : > { %2470 = vmatpush1.msra.mxu0 %v5812_v9  ;;  %2644 = vmatprep.mubr.f32.mxu1 %v5743_v16  ;;  %v5223_v9 = vand.u32 4294901760, %v2721_v13  ;;  %v2929_v32 = vand.u32 4294901760, %v2928_v2  ;;  %v5243_v35 = vand.u32 4294901760, %v2719_v18  ;;  %v5819_v7 = vand.u32 4294901760, %v4934_v62 }
 0x1b3   : > { %2906 = vmatpush1.msra.mxu1 %v2905_v17  ;;  %2267 = vmatmul.mubr.f32.gmra.mxu0 %v5813_v37  ;;  %v2957_v17 = vand.u32 4294901760, %v5196_v53  ;;  %v5233_v37 = vsub.f32 %v2723_v8, %v5198_v47  ;;  %v5820_v8 = vand.u32 4294901760, %v5181_v44  ;;  %v5252_v2 = vsub.f32 %v2722_v49, %v5217_v14 }
 0x1b4   : > { %2474 = vmatprep.subr.mxu0 %v5815_v54  ;;  %2646 = vmatmul.mubr.f32.gmra.mxu1 %v4616_v61  ;;  %v2946_v54 = vsub.f32 %v5171_v60, %v5818_v57  ;;  %v2935_v57 = vand.u32 4294901760, %v2934_v31  ;;  %v5257_v28 = vsub.f32 %v2721_v13, %v5223_v9  ;;  %v2941_v62 = vand.u32 4294901760, %v2940_v40 }
 0x1b5   : > { %2912 = vmatprep.subr.mxu1 %v2911_v39  ;;  %2478 = vmatpush1.msra.mxu0 %v5817_v52  ;;  %v2952_v39 = vsub.f32 %v5181_v44, %v5820_v8  ;;  %v5821_v52 = vand.u32 4294901760, %v4941_v10  ;;  %v2975_v49 = vand.u32 4294901760, %v5233_v37  ;;  %v5822_v13 = vand.u32 4294901760, %v5208_v48 }
 0x1b6   : > { %2918 = vmatpush1.msra.mxu1 %v2917_v34  ;;  %2482 = vmatprep.subr.mxu0 %v5819_v7  ;;  %v2958_v34 = vsub.f32 %v5196_v53, %v2957_v17  ;;  %v2947_v10 = vand.u32 4294901760, %v2946_v54  ;;  %v5273_v7 = vsub.f32 %v2719_v18, %v5243_v35  ;;  %v2987_v54 = vand.u32 4294901760, %v5257_v28 }
 0x1b7   : > { %2924 = vmatprep.subr.mxu1 %v2923_v27  ;;  %2486 = vmatpush1.msra.mxu0 %v5821_v52  ;;  %v5266_v27 = vsub.f32 %v2720_v24, %v5235_v19  ;;  %v2964_v31 = vsub.f32 %v5208_v48, %v5822_v13  ;;  %v2953_v40 = vand.u32 4294901760, %v2952_v39  ;;  %v2970_v24 = vsub.f32 %v5215_v11, %v2969_v0 }
 0x1b8   : > { %2519 = vmatprep.mubr.f32.mxu0 %v5743_v16  ;;  %2651 = vmatprep.mubr.f32.mxu1 %v5743_v16  ;;  %v2959_v18 = vand.u32 4294901760, %v2958_v34  ;;  %v2976_v8 = vsub.f32 %v5233_v37, %v2975_v49  ;;  %v2988_v34 = vsub.f32 %v5257_v28, %v2987_v54 }
 0x1b9   : > { %2930 = vmatpush1.msra.mxu1 %v2929_v32  ;;  %2521 = vmatmul.mubr.f32.vlgmr.msra.gmra.mxu0 %v4604_v46  ;;  %v2981_v32 = vand.u32 4294901760, %v5252_v2  ;;  %v2993_v39 = vand.u32 4294901760, %v5266_v27  ;;  %v2965_v52 = vand.u32 4294901760, %v2964_v31  ;;  %v2971_v13 = vand.u32 4294901760, %v2970_v24 }
 0x1ba   : > { %2653 = vmatmul.mubr.f32.gmra.mxu1 %v4630_v55  ;;  %2758 = vmatprep.subr.mxu0 %v5064_v42 }
 0x1bb   : > { %2936 = vmatprep.subr.mxu1 %v2935_v57  ;;  %2760 = vmatpush1.msra.mxu0 %v5075_v6  ;;  %v2999_v57 = vand.u32 4294901760, %v5273_v7  ;;  %v2994_v31 = vsub.f32 %v5266_v27, %v2993_v39 }
 0x1bc   : > { %2942 = vmatpush1.msra.mxu1 %v2941_v62  ;;  %2526 = vmatprep.mubr.f32.mxu0 %v5743_v16  ;;  %v2982_v62 = vsub.f32 %v5252_v2, %v2981_v32 }
 0x1bd   : > { %2948 = vmatprep.subr.mxu1 %v2947_v10  ;;  %2658 = vmatprep.mubr.f32.mxu1 %v5743_v16  ;;  %v2977_v10 = vand.u32 4294901760, %v2976_v8  ;;  %v2995_v8 = vand.u32 4294901760, %v2994_v31 }
 0x1be   : > { %2762 = vmatprep.subr.mxu0 %v5084_v4  ;;  %2954 = vmatpush1.msra.mxu1 %v2953_v40  ;;  %v3000_v40 = vsub.f32 %v5273_v7, %v2999_v57  ;;  %v2983_v24 = vand.u32 4294901760, %v2982_v62 }
 0x1bf   : > { %2528 = vmatmul.mubr.f32.gmra.mxu0 %v4616_v61  ;;  %2660 = vmatmul.mubr.f32.gmra.mxu1 %v4649_v21 }
 0x1c0   : > { %2764 = vmatpush1.msra.mxu0 %v5089_v63  ;;  %2960 = vmatprep.subr.mxu1 %v2959_v18  ;;  %v2989_v18 = vand.u32 4294901760, %v2988_v34 }
 0x1c1   : > { %2766 = vmatprep.subr.mxu0 %v5096_v15  ;;  %2966 = vmatpush1.msra.mxu1 %v2965_v52  ;;  %v3001_v52 = vand.u32 4294901760, %v3000_v40  ;;  %v5828_v40 = vand.u32 4294901760, %v5094_v5 }
 0x1c2   : > { %2768 = vmatpush1.msra.mxu0 %v5108_v22  ;;  %2972 = vmatprep.subr.mxu1 %v2971_v13 }
 0x1c3   : > { %2533 = vmatprep.mubr.f32.mxu0 %v5743_v16  ;;  %2665 = vmatprep.mubr.f32.mxu1 %v5743_v16 }
 0x1c4   : > { %2770 = vmatprep.subr.mxu0 %v5122_v29  ;;  %2978 = vmatpush1.msra.mxu1 %v2977_v10  ;;  %v5826_v10 = vld [vmem:[#allocation20_spill] sm:$0xff] }
 0x1c5   : > { %2535 = vmatmul.mubr.f32.gmra.mxu0 %v4630_v55  ;;  %2667 = vmatmul.mubr.f32.gmra.mxu1 %v4670_v45 }
 0x1c6   : > { %2772 = vmatpush1.msra.mxu0 %v5130_v36  ;;  %2984 = vmatprep.subr.mxu1 %v2983_v24 }
 0x1c7   : > { %2774 = vmatprep.subr.mxu0 %v5138_v25  ;;  %2990 = vmatpush1.msra.mxu1 %v2989_v18 }
 0x1c8   : > { %2776 = vmatpush1.msra.mxu0 %v5144_v59  ;;  %2996 = vmatprep.subr.mxu1 %v2995_v8 }
 0x1c9   : > { %2540 = vmatprep.mubr.f32.mxu0 %v5743_v16  ;;  %3002 = vmatpush1.msra.mxu1 %v3001_v52  ;;  %v5829_v52 = vand.u32 4294901760, %v5106_v23 }
 0x1ca   : > { %3035 = vmatprep.mubr.f32.mxu1 %v5743_v16  ;;  %2542 = vmatmul.mubr.f32.gmra.mxu0 %v4649_v21 }
 0x1cb   : > { %2778 = vmatprep.subr.mxu0 %v5162_v58  ;;  %3037 = vmatmul.mubr.f32.vlgmr.msra.gmra.mxu1 %v4604_v46 }
 0x1cc   : > { %2780 = vmatpush1.msra.mxu0 %v5173_v30  ;;  %3227 = vmatprep.subr.mxu1 %v5064_v42 }
 0x1cd   : > { %2782 = vmatprep.subr.mxu0 %v5183_v26  ;;  %2547 = vmatprep.mubr.f32.mxu0 %v5743_v16 }
 0x1ce   : > { %2784 = vmatpush1.msra.mxu0 %v5198_v47  ;;  %3042 = vmatprep.mubr.f32.mxu1 %v5743_v16 }
 0x1cf   : > { %3229 = vmatpush1.msra.mxu1 %v5075_v6  ;;  %2549 = vmatmul.mubr.f32.gmra.mxu0 %v4670_v45 }
 0x1d0   : > { %2786 = vmatprep.subr.mxu0 %v5217_v14  ;;  %3044 = vmatmul.mubr.f32.gmra.mxu1 %v4616_v61 }
 0x1d1   : > { %3231 = vmatprep.subr.mxu1 %v5084_v4  ;;  %2788 = vmatpush1.msra.mxu0 %v5223_v9 }
 0x1d2   : > { %3233 = vmatpush1.msra.mxu1 %v5089_v63  ;;  %2790 = vmatprep.subr.mxu0 %v5235_v19 }
 0x1d3   : > { %3235 = vmatprep.subr.mxu1 %v5096_v15  ;;  %2792 = vmatpush1.msra.mxu0 %v5243_v35 }
 0x1d4   : > { %2825 = vmatprep.mubr.f32.mxu0 %v5743_v16  ;;  %3049 = vmatprep.mubr.f32.mxu1 %v5743_v16 }
 0x1d5   : > { %3237 = vmatpush1.msra.mxu1 %v5108_v22  ;;  %2831 = vmatmul.mubr.f32.vlgmr.msra.gmra.mxu0 %v4632_v1 }
 0x1d6   : > { %3051 = vmatmul.mubr.f32.gmra.mxu1 %v4630_v55  ;;  %3087 = vmatprep.subr.mxu0 %v5080_v56 }
 0x1d7   : > { %3239 = vmatprep.subr.mxu1 %v5122_v29  ;;  %3090 = vmatpush1.msra.mxu0 %v5094_v5 }
 0x1d8   : > { %3241 = vmatpush1.msra.mxu1 %v5130_v36  ;;  %2836 = vmatprep.mubr.f32.mxu0 %v5743_v16 }
 0x1d9   : > { %3243 = vmatprep.subr.mxu1 %v5138_v25  ;;  %3056 = vmatprep.mubr.f32.mxu1 %v5743_v16 }
 0x1da   : > { %3093 = vmatprep.subr.mxu0 %v5106_v23  ;;  %3245 = vmatpush1.msra.mxu1 %v5144_v59 }
 0x1db   : > { %2842 = vmatmul.mubr.f32.gmra.mxu0 %v4653_v12  ;;  %3058 = vmatmul.mubr.f32.gmra.mxu1 %v4649_v21 }
 0x1dc   : > { %3096 = vmatpush1.msra.mxu0 %v5114_v3  ;;  %3247 = vmatprep.subr.mxu1 %v5162_v58 }
 0x1dd   : > { %3099 = vmatprep.subr.mxu0 %v5120_v41  ;;  %3249 = vmatpush1.msra.mxu1 %v5173_v30 }
 0x1de   : > { %3102 = vmatpush1.msra.mxu0 %v5136_v50  ;;  %3251 = vmatprep.subr.mxu1 %v5183_v26 }
 0x1df   : > { %2847 = vmatprep.mubr.f32.mxu0 %v5743_v16  ;;  %3063 = vmatprep.mubr.f32.mxu1 %v5743_v16 }
 0x1e0   : > { %3105 = vmatprep.subr.mxu0 %v5154_v38  ;;  %3253 = vmatpush1.msra.mxu1 %v5198_v47 }
 0x1e1   : > { %2853 = vmatmul.mubr.f32.gmra.mxu0 %v4674_v33  ;;  %3065 = vmatmul.mubr.f32.gmra.mxu1 %v4670_v45  ;;  %v5823_v33 = vld [vmem:[#allocation25_spill] sm:$0xff] }
 0x1e2   : > { %3108 = vmatpush1.msra.mxu0 %v5160_v43  ;;  %3255 = vmatprep.subr.mxu1 %v5217_v14 }
 0x1e3   : > { %3111 = vmatprep.subr.mxu0 %v5171_v60  ;;  %3257 = vmatpush1.msra.mxu1 %v5223_v9 }
 0x1e4   : > { %3114 = vmatpush1.msra.mxu0 %v5181_v44  ;;  %3259 = vmatprep.subr.mxu1 %v5235_v19 }
 0x1e5   : > { %2858 = vmatprep.mubr.f32.mxu0 %v5743_v16  ;;  %3261 = vmatpush1.msra.mxu1 %v5243_v35 }
 0x1e6   : > { %3294 = vmatprep.mubr.f32.mxu1 %v5743_v16  ;;  %2864 = vmatmul.mubr.f32.gmra.mxu0 %v4697_v20 }
 0x1e7   : > { %3117 = vmatprep.subr.mxu0 %v5196_v53  ;;  %3298 = vmatmul.mubr.f32.vlgmr.msra.gmra.mxu1 %v4614_v51  ;;  %v1207_v1 = vpop.f32.mrf.mxu1  ;;  %v5824_v51 = vld [vmem:[#allocation18_spill] sm:$0xff] }
 0x1e8   : > { %3120 = vmatpush1.msra.mxu0 %v5208_v48  ;;  %3509 = vmatprep.subr.mxu1 %v5064_v42 }
 0x1e9   : > { %3123 = vmatprep.subr.mxu0 %v5215_v11  ;;  %2869 = vmatprep.mubr.f32.mxu0 %v5743_v16  ;;  %v1209_v12 = vpop.f32.mrf.mxu1 }
 0x1ea   : > { %3126 = vmatpush1.msra.mxu0 %v5233_v37  ;;  %3303 = vmatprep.mubr.f32.mxu1 %v5743_v16 }
 0x1eb   : > { %3511 = vmatpush1.msra.mxu1 %v5075_v6  ;;  %2875 = vmatmul.mubr.f32.gmra.mxu0 %v5823_v33  ;;  %v1214_v20 = vpop.f32.mrf.mxu1 }
 0x1ec   : > { %3129 = vmatprep.subr.mxu0 %v5252_v2  ;;  %3307 = vmatmul.mubr.f32.gmra.mxu1 %v5824_v51 }
 0x1ed   : > { %3513 = vmatprep.subr.mxu1 %v5084_v4  ;;  %3132 = vmatpush1.msra.mxu0 %v5257_v28  ;;  %v1216_v42 = vpop.f32.mrf.mxu1  ;;  %v5825_v4 = vld [vmem:[#allocation16_spill] sm:$0xff] }
 0x1ee   : > { %3515 = vmatpush1.msra.mxu1 %v5089_v63  ;;  %3135 = vmatprep.subr.mxu0 %v5266_v27 }
 0x1ef   : > { %3517 = vmatprep.subr.mxu1 %v5096_v15  ;;  %3138 = vmatpush1.msra.mxu0 %v5273_v7  ;;  %v1003_v6 = vpop.f32.mrf.mxu0  ;;  %v1221_v13 = vpop.f32.mrf.mxu1  ;;  %v5827_v15 = vand.u32 4294901760, %v5080_v56 }
 0x1f0   : > { %3171 = vmatprep.mubr.f32.mxu0 %v5743_v16  ;;  %3312 = vmatprep.mubr.f32.mxu1 %v5743_v16  ;;  %v5395_v62 = vadd.f32 %v1207_v1, %v1003_v6  ;;  %v5832_v1 = vand.u32 4294901760, %v5114_v3  ;;  %v5840_v6 = vand.u32 4294901760, %v5181_v44 }
 0x1f1   : > { %3519 = vmatpush1.msra.mxu1 %v5108_v22  ;;  %3174 = vmatmul.mubr.f32.vlgmr.msra.gmra.mxu0 %v5825_v4  ;;  %v1005_v34 = vpop.f32.mrf.mxu0  ;;  %v1223_v63 = vpop.f32.mrf.mxu1 }
 0x1f2   : > { %3316 = vmatmul.mubr.f32.gmra.mxu1 %v5826_v10  ;;  %3357 = vmatprep.subr.mxu0 %v5827_v15  ;;  %v5402_v31 = vadd.f32 %v1209_v12, %v1005_v34 }
 0x1f3   : > { %3521 = vmatprep.subr.mxu1 %v5122_v29  ;;  %3361 = vmatpush1.msra.mxu0 %v5828_v40  ;;  %v1014_v24 = vpop.f32.mrf.mxu0  ;;  %v1228_v18 = vpop.f32.mrf.mxu1  ;;  %v5830_v29 = vld [vmem:[#allocation17_spill] sm:$0xff] }
 0x1f4   : > { %3523 = vmatpush1.msra.mxu1 %v5130_v36  ;;  %3179 = vmatprep.mubr.f32.mxu0 %v5743_v16  ;;  %v5409_v22 = vadd.f32 %v1214_v20, %v1014_v24  ;;  %v5831_v36 = vld [vmem:[#allocation22_spill] sm:$0xff]  ;;  %v5836_v20 = vld [vmem:[#allocation19_spill] sm:$0xff] }
 0x1f5   : > { %3525 = vmatprep.subr.mxu1 %v5138_v25  ;;  %3321 = vmatprep.mubr.f32.mxu1 %v5743_v16  ;;  %v1016_v56 = vpop.f32.mrf.mxu0  ;;  %v1230_v8 = vpop.f32.mrf.mxu1  ;;  %v5833_v25 = vand.u32 4294901760, %v5120_v41  ;;  %v5835_v41 = vand.u32 4294901760, %v5154_v38 }
 0x1f6   : > { %3365 = vmatprep.subr.mxu0 %v5829_v52  ;;  %3527 = vmatpush1.msra.mxu1 %v5144_v59  ;;  %v5416_v5 = vadd.f32 %v1216_v42, %v1016_v56  ;;  %v5834_v59 = vand.u32 4294901760, %v5136_v50  ;;  %v5837_v50 = vld [vmem:[#allocation24_spill] sm:$0xff]  ;;  %v5839_v42 = vand.u32 4294901760, %v5171_v60  ;;  %v5841_v60 = vld [vmem:[#allocation21_spill] sm:$0xff] }
 0x1f7   : > { %3182 = vmatmul.mubr.f32.gmra.mxu0 %v5830_v29  ;;  %3325 = vmatmul.mubr.f32.gmra.mxu1 %v5831_v36 }
 0x1f8   : > { %3369 = vmatpush1.msra.mxu0 %v5832_v1  ;;  %3529 = vmatprep.subr.mxu1 %v5162_v58 }
 0x1f9   : > { %3373 = vmatprep.subr.mxu0 %v5833_v25  ;;  %3531 = vmatpush1.msra.mxu1 %v5173_v30  ;;  %v1025_v23 = vpop.f32.mrf.mxu0  ;;  %v1235_v12 = vpop.f32.mrf.mxu1 }
 0x1fa   : > { %3377 = vmatpush1.msra.mxu0 %v5834_v59  ;;  %3533 = vmatprep.subr.mxu1 %v5183_v26  ;;  %v5429_v33 = vadd.f32 %v1221_v13, %v1025_v23  ;;  %v5838_v26 = vand.u32 4294901760, %v5160_v43 }
 0x1fb   : > { %3187 = vmatprep.mubr.f32.mxu0 %v5743_v16  ;;  %3330 = vmatprep.mubr.f32.mxu1 %v5743_v16  ;;  %v1027_v3 = vpop.f32.mrf.mxu0  ;;  %v1236_v58 = vpop.f32.mrf.mxu1 }
 0x1fc   : > { %3381 = vmatprep.subr.mxu0 %v5835_v41  ;;  %3535 = vmatpush1.msra.mxu1 %v5198_v47  ;;  %v5436_v30 = vadd.f32 %v1223_v63, %v1027_v3 }
 0x1fd   : > { %3190 = vmatmul.mubr.f32.gmra.mxu0 %v5836_v20  ;;  %3334 = vmatmul.mubr.f32.gmra.mxu1 %v5837_v50 }
 0x1fe   : > { %3385 = vmatpush1.msra.mxu0 %v5838_v26  ;;  %3537 = vmatprep.subr.mxu1 %v5217_v14  ;;  %v1036_v51 = vpop.f32.mrf.mxu0 }
 0x1ff   : > { %3389 = vmatprep.subr.mxu0 %v5839_v42  ;;  %3539 = vmatpush1.msra.mxu1 %v5223_v9  ;;  %v5446_v38 = vadd.f32 %v1228_v18, %v1036_v51  ;;  %v1464_v47 = vpop.f32.mrf.mxu1  ;;  %v5842_v9 = vand.u32 4294901760, %v5208_v48 }
 0x200   : > { %3393 = vmatpush1.msra.mxu0 %v5840_v6  ;;  %3541 = vmatprep.subr.mxu1 %v5235_v19  ;;  %v1038_v13 = vpop.f32.mrf.mxu0 }
 0x201   : > { %3195 = vmatprep.mubr.f32.mxu0 %v5743_v16  ;;  %3543 = vmatpush1.msra.mxu1 %v5243_v35  ;;  %v5453_v14 = vadd.f32 %v1230_v8, %v1038_v13  ;;  %v1466_v43 = vpop.f32.mrf.mxu1 }
 0x202   : > { %3576 = vmatprep.mubr.f32.mxu1 %v5743_v16  ;;  %3198 = vmatmul.mubr.f32.gmra.mxu0 %v5841_v60 }
 0x203   : > { %3397 = vmatprep.subr.mxu0 %v2957_v17  ;;  %3578 = vmatmul.mubr.f32.vlgmr.msra.gmra.mxu1 %v4604_v46  ;;  %v1047_v44 = vpop.f32.mrf.mxu0  ;;  %v5843_v17 = vld [vmem:[#allocation23_spill] sm:$0xff] }
 0x204   : > { %3401 = vmatpush1.msra.mxu0 %v5842_v9  ;;  %3203 = vmatprep.mubr.f32.mxu0 %v5743_v16  ;;  %v1473_v19 = vpop.f32.mrf.mxu1 }
 0x205   : > { %3405 = vmatprep.subr.mxu0 %v2969_v0  ;;  %3583 = vmatprep.mubr.f32.mxu1 %v5743_v16  ;;  %v1048_v35 = vpop.f32.mrf.mxu0 }
 0x206   : > { %3409 = vmatpush1.msra.mxu0 %v2975_v49  ;;  %v1475_v53 = vpop.f32.mrf.mxu1 }
 0x207   : > { %3206 = vmatmul.mubr.f32.gmra.mxu0 %v5843_v17  ;;  %3413 = vmatprep.subr.mxu0 %v2981_v32 }
 0x208   : > { %3585 = vmatmul.mubr.f32.gmra.mxu1 %v4616_v61  ;;  %3417 = vmatpush1.msra.mxu0 %v2987_v54 }
 0x209   : > { %3421 = vmatprep.subr.mxu0 %v2993_v39  ;;  %3458 = vmatprep.mubr.f32.mxu0 %v5743_v16  ;;  %v1342_v48 = vpop.f32.mrf.mxu0 }
 0x20a   : > { %3425 = vmatpush1.msra.mxu0 %v2999_v57  ;;  %3590 = vmatprep.mubr.f32.mxu1 %v5743_v16  ;;  %v1343_v37 = vadd.f32 %v1342_v48, %v5395_v62  ;;  %v1482_v11 = vpop.f32.mrf.mxu1 }
 0x20b   : > { %3460 = vmatmul.mubr.f32.vlgmr.msra.gmra.mxu0 %v4604_v46  ;;  %v1344_v0 = vpop.f32.mrf.mxu0 }
 0x20c   : > { %3592 = vmatmul.mubr.f32.gmra.mxu1 %v4630_v55  ;;  %3465 = vmatprep.mubr.f32.mxu0 %v5743_v16  ;;  %v1345_v28 = vadd.f32 %v1344_v0, %v5402_v31  ;;  %v1484_v2 = vpop.f32.mrf.mxu1  ;;  %v1465_v49 = vadd.f32 %v1464_v47, %v1343_v37 }
 0x20d   : > { %3597 = vmatprep.mubr.f32.mxu1 %v5743_v16 }
 0x20e   : > { %v1467_v27 = vadd.f32 %v1466_v43, %v1345_v28 }
 0x20f   : > { %3467 = vmatmul.mubr.f32.gmra.mxu0 %v4616_v61  ;;  %v1350_v7 = vpop.f32.mrf.mxu0  ;;  %v1491_v32 = vpop.f32.mrf.mxu1 }
 0x210   : > { %3599 = vmatmul.mubr.f32.gmra.mxu1 %v4649_v21  ;;  %3472 = vmatprep.mubr.f32.mxu0 %v5743_v16  ;;  %v1351_v46 = vadd.f32 %v1350_v7, %v5409_v22 }
 0x211   : > { %3604 = vmatprep.mubr.f32.mxu1 %v5743_v16  ;;  %v1352_v54 = vpop.f32.mrf.mxu0  ;;  %v1493_v39 = vpop.f32.mrf.mxu1 }
 0x212   : > { %v1353_v57 = vadd.f32 %v1352_v54, %v5416_v5  ;;  %v1474_v62 = vadd.f32 %v1473_v19, %v1351_v46 }
 0x213   : > { %3474 = vmatmul.mubr.f32.gmra.mxu0 %v4630_v55 }
 0x214   : > { %3606 = vmatmul.mubr.f32.gmra.mxu1 %v4670_v45  ;;  %3479 = vmatprep.mubr.f32.mxu0 %v5743_v16  ;;  %v1476_v61 = vadd.f32 %v1475_v53, %v1353_v57 }
 0x215   : > { %v1358_v4 = vpop.f32.mrf.mxu0  ;;  %v1500_v34 = vpop.f32.mrf.mxu1 }
 0x216   : > { %v1359_v63 = vadd.f32 %v1358_v4, %v5429_v33 }
 0x217   : > { %3481 = vmatmul.mubr.f32.gmra.mxu0 %v4649_v21  ;;  %v1360_v10 = vpop.f32.mrf.mxu0  ;;  %v1501_v15 = vpop.f32.mrf.mxu1 }
 0x218   : > { %3486 = vmatprep.mubr.f32.mxu0 %v5743_v16  ;;  %v1361_v31 = vadd.f32 %v1360_v10, %v5436_v30  ;;  %v1483_v40 = vadd.f32 %v1482_v11, %v1359_v63 }
 0x21a   : > { %v1366_v24 = vpop.f32.mrf.mxu0  ;;  %v1485_v55 = vadd.f32 %v1484_v2, %v1361_v31 }
 0x21b   : > { %3488 = vmatmul.mubr.f32.gmra.mxu0 %v4670_v45  ;;  %v1367_v18 = vadd.f32 %v1366_v24, %v5446_v38  ;;  %v1740_v22 = vpop.f32.mrf.mxu1 }
 0x21c   : > { %v1368_v56 = vpop.f32.mrf.mxu0 }
 0x21d   : > { %v1369_v8 = vadd.f32 %v1368_v56, %v5453_v14  ;;  %v1742_v52 = vpop.f32.mrf.mxu1  ;;  %v1492_v5 = vadd.f32 %v1491_v32, %v1367_v18 }
 0x21f   : > { %v1374_v21 = vpop.f32.mrf.mxu0  ;;  %v1494_v29 = vadd.f32 %v1493_v39, %v1369_v8 }
 0x220   : > { %v1747_v36 = vpop.f32.mrf.mxu1 }
 0x221   : > { %v1375_v1 = vpop.f32.mrf.mxu0 }
 0x222   : > { %v1749_v16 = vpop.f32.mrf.mxu1 }
 0x225   : > { %v1624_v25 = vpop.f32.mrf.mxu0 }
 0x226   : > { %v1625_v23 = vadd.f32 %v1624_v25, %v1465_v49  ;;  %v1754_v12 = vpop.f32.mrf.mxu1 }
 0x227   : > { %v1626_v59 = vpop.f32.mrf.mxu0 }
 0x228   : > { %v5502_v33 = vadd.f32 %v1740_v22, %v1625_v23  ;;  %v1627_v45 = vadd.f32 %v1626_v59, %v1467_v27  ;;  %v1756_v3 = vpop.f32.mrf.mxu1 }
 0x22a   : > { %v5504_v58 = vadd.f32 %v1742_v52, %v1627_v45 }
 0x22b   : > { %v1631_v41 = vpop.f32.mrf.mxu0  ;;  %v1761_v30 = vpop.f32.mrf.mxu1 }
 0x22c   : > { %v1632_v20 = vadd.f32 %v1631_v41, %v1474_v62 }
 0x22d   : > { %v1633_v50 = vpop.f32.mrf.mxu0  ;;  %v1763_v26 = vpop.f32.mrf.mxu1 }
 0x22e   : > { %v5506_v51 = vadd.f32 %v1747_v36, %v1632_v20  ;;  %v1634_v42 = vadd.f32 %v1633_v50, %v1476_v61 }
 0x230   : > { %v5508_v38 = vadd.f32 %v1749_v16, %v1634_v42 }
 0x231   : > { %v1638_v47 = vpop.f32.mrf.mxu0  ;;  %v1768_v6 = vpop.f32.mrf.mxu1 }
 0x232   : > { %v1639_v13 = vadd.f32 %v1638_v47, %v1483_v40 }
 0x233   : > { %v1640_v14 = vpop.f32.mrf.mxu0  ;;  %v1769_v43 = vpop.f32.mrf.mxu1 }
 0x234   : > { %v5510_v60 = vadd.f32 %v1754_v12, %v1639_v13  ;;  %v1641_v44 = vadd.f32 %v1640_v14, %v1485_v55 }
 0x236   : > { %v5512_v9 = vadd.f32 %v1756_v3, %v1641_v44  ;;  %v1645_v19 = vpop.f32.mrf.mxu0 }
 0x237   : > { %v1646_v35 = vadd.f32 %v1645_v19, %v1492_v5  ;;  %v2099_v53 = vpop.f32.mrf.mxu1 }
 0x238   : > { %v1647_v17 = vpop.f32.mrf.mxu0 }
 0x239   : > { %v5514_v48 = vadd.f32 %v1761_v30, %v1646_v35  ;;  %v1648_v37 = vadd.f32 %v1647_v17, %v1494_v29  ;;  %v2101_v11 = vpop.f32.mrf.mxu1 }
 0x23b   : > { %v5516_v0 = vadd.f32 %v1763_v26, %v1648_v37  ;;  %v1652_v28 = vpop.f32.mrf.mxu0 }
 0x23c   : > { %v2106_v2 = vpop.f32.mrf.mxu1 }
 0x23d   : > { %v1653_v49 = vpop.f32.mrf.mxu0 }
 0x23e   : > { %v2108_v27 = vpop.f32.mrf.mxu1 }
 0x241   : > { %v1893_v7 = vpop.f32.mrf.mxu0 }
 0x242   : > { %v2100_v32 = vadd.f32 %v2099_v53, %v1893_v7  ;;  %v2113_v46 = vpop.f32.mrf.mxu1 }
 0x243   : > { %v1895_v54 = vpop.f32.mrf.mxu0 }
 0x244   : > { %v2102_v39 = vadd.f32 %v2101_v11, %v1895_v54  ;;  %v2115_v57 = vpop.f32.mrf.mxu1 }
 0x247   : > { %v1904_v62 = vpop.f32.mrf.mxu0  ;;  %v2120_v61 = vpop.f32.mrf.mxu1 }
 0x248   : > { %v2107_v4 = vadd.f32 %v2106_v2, %v1904_v62 }
 0x249   : > { %v1906_v34 = vpop.f32.mrf.mxu0  ;;  %v2122_v63 = vpop.f32.mrf.mxu1 }
 0x24a   : > { %v2109_v10 = vadd.f32 %v2108_v27, %v1906_v34 }
 0x24d   : > { %v1915_v15 = vpop.f32.mrf.mxu0  ;;  %v2127_v31 = vpop.f32.mrf.mxu1 }
 0x24e   : > { %v2114_v40 = vadd.f32 %v2113_v46, %v1915_v15 }
 0x24f   : > { %v1917_v24 = vpop.f32.mrf.mxu0  ;;  %v2129_v55 = vpop.f32.mrf.mxu1 }
 0x250   : > { %v2116_v18 = vadd.f32 %v2115_v57, %v1917_v24 }
 0x252   : > { %v1926_v22 = vpop.f32.mrf.mxu0 }
 0x253   : > { %v2121_v56 = vadd.f32 %v2120_v61, %v1926_v22  ;;  %v2360_v8 = vpop.f32.mrf.mxu1 }
 0x254   : > { %v1928_v52 = vpop.f32.mrf.mxu0 }
 0x255   : > { %v2123_v5 = vadd.f32 %v2122_v63, %v1928_v52  ;;  %v2362_v21 = vpop.f32.mrf.mxu1 }
 0x257   : > { %v1937_v29 = vpop.f32.mrf.mxu0 }
 0x258   : > { %v2128_v36 = vadd.f32 %v2127_v31, %v1937_v29  ;;  %v2369_v1 = vpop.f32.mrf.mxu1 }
 0x259   : > { %v1939_v16 = vpop.f32.mrf.mxu0 }
 0x25a   : > { %v2130_v25 = vadd.f32 %v2129_v55, %v1939_v16  ;;  %v2371_v23 = vpop.f32.mrf.mxu1 }
 0x25d   : > { %v2236_v12 = vpop.f32.mrf.mxu0 }
 0x25e   : > { %v2237_v59 = vadd.f32 %v2236_v12, %v2100_v32  ;;  %v2378_v45 = vpop.f32.mrf.mxu1 }
 0x25f   : > { %v2238_v3 = vpop.f32.mrf.mxu0 }
 0x260   : > { %v2239_v41 = vadd.f32 %v2238_v3, %v2102_v39  ;;  %v2380_v30 = vpop.f32.mrf.mxu1  ;;  %v2361_v20 = vadd.f32 %v2360_v8, %v2237_v59 }
 0x262   : > { %v2363_v50 = vadd.f32 %v2362_v21, %v2239_v41 }
 0x263   : > { %v2244_v26 = vpop.f32.mrf.mxu0  ;;  %v2387_v42 = vpop.f32.mrf.mxu1 }
 0x264   : > { %v2245_v47 = vadd.f32 %v2244_v26, %v2107_v4 }
 0x265   : > { %v2246_v6 = vpop.f32.mrf.mxu0  ;;  %v2389_v13 = vpop.f32.mrf.mxu1 }
 0x266   : > { %v2247_v14 = vadd.f32 %v2246_v6, %v2109_v10  ;;  %v2370_v43 = vadd.f32 %v2369_v1, %v2245_v47 }
 0x268   : > { %v2372_v44 = vadd.f32 %v2371_v23, %v2247_v14 }
 0x269   : > { %v2252_v19 = vpop.f32.mrf.mxu0  ;;  %v2396_v35 = vpop.f32.mrf.mxu1 }
 0x26a   : > { %v2253_v53 = vadd.f32 %v2252_v19, %v2114_v40 }
 0x26b   : > { %v2254_v17 = vpop.f32.mrf.mxu0  ;;  %v2398_v37 = vpop.f32.mrf.mxu1 }
 0x26c   : > { %v2255_v11 = vadd.f32 %v2254_v17, %v2116_v18  ;;  %v2379_v28 = vadd.f32 %v2378_v45, %v2253_v53 }
 0x26e   : > { %v2260_v2 = vpop.f32.mrf.mxu0  ;;  %v2381_v49 = vadd.f32 %v2380_v30, %v2255_v11 }
 0x26f   : > { %v2261_v27 = vadd.f32 %v2260_v2, %v2121_v56  ;;  %v2640_v7 = vpop.f32.mrf.mxu1 }
 0x270   : > { %v2262_v32 = vpop.f32.mrf.mxu0 }
 0x271   : > { %v2263_v46 = vadd.f32 %v2262_v32, %v2123_v5  ;;  %v2642_v54 = vpop.f32.mrf.mxu1  ;;  %v2388_v39 = vadd.f32 %v2387_v42, %v2261_v27 }
 0x273   : > { %v2268_v57 = vpop.f32.mrf.mxu0  ;;  %v2390_v62 = vadd.f32 %v2389_v13, %v2263_v46 }
 0x274   : > { %v2269_v61 = vadd.f32 %v2268_v57, %v2128_v36  ;;  %v2647_v4 = vpop.f32.mrf.mxu1 }
 0x275   : > { %v2270_v34 = vpop.f32.mrf.mxu0 }
 0x276   : > { %v2271_v63 = vadd.f32 %v2270_v34, %v2130_v25  ;;  %v2649_v10 = vpop.f32.mrf.mxu1  ;;  %v2397_v15 = vadd.f32 %v2396_v35, %v2269_v61 }
 0x278   : > { %v2399_v31 = vadd.f32 %v2398_v37, %v2271_v63 }
 0x279   : > { %v2522_v40 = vpop.f32.mrf.mxu0 }
 0x27a   : > { %v2654_v24 = vpop.f32.mrf.mxu1  ;;  %v2523_v18 = vadd.f32 %v2522_v40, %v2361_v20 }
 0x27b   : > { %v2524_v55 = vpop.f32.mrf.mxu0 }
 0x27c   : > { %v2656_v22 = vpop.f32.mrf.mxu1  ;;  %v2525_v56 = vadd.f32 %v2524_v55, %v2363_v50  ;;  %v2641_v5 = vadd.f32 %v2640_v7, %v2523_v18 }
 0x27e   : > { %v2643_v16 = vadd.f32 %v2642_v54, %v2525_v56  ;;  %v2684_v25 = vrot.slane %v2641_v5, 1 }
 0x27f   : > { %v2529_v8 = vpop.f32.mrf.mxu0  ;;  %v2661_v52 = vpop.f32.mrf.mxu1 }
 0x280   : > { %v2530_v21 = vadd.f32 %v2529_v8, %v2370_v43  ;;  %v2687_v41 = vrot.slane %v2643_v16, 1 }
 0x281   : > { %v2531_v29 = vpop.f32.mrf.mxu0  ;;  %v2663_v1 = vpop.f32.mrf.mxu1 }
 0x282   : > { %v2648_v36 = vadd.f32 %v2647_v4, %v2530_v21  ;;  %v2532_v23 = vadd.f32 %v2531_v29, %v2372_v44 }
 0x284   : > { %v2685_v12 = vrot.slane %v2648_v36, 1  ;;  %v2650_v59 = vadd.f32 %v2649_v10, %v2532_v23 }
 0x285   : > { %v2536_v45 = vpop.f32.mrf.mxu0  ;;  %v2668_v3 = vpop.f32.mrf.mxu1 }
 0x286   : > { %v2686_v30 = vsel %vm2683_vm4, %v2684_v25, %v2685_v12  ;;  %v2688_v20 = vrot.slane %v2650_v59, 1  ;;  %v2537_v50 = vadd.f32 %v2536_v45, %v2379_v28 }
 0x287   : > { %v5520_v26 = vadd.f32 %v2686_v30, %v5502_v33  ;;  %v2538_v42 = vpop.f32.mrf.mxu0  ;;  %v2670_v47 = vpop.f32.mrf.mxu1 }
 0x288   : > { %v2689_v6 = vsel %vm2683_vm4, %v2687_v41, %v2688_v20  ;;  %v2655_v13 = vadd.f32 %v2654_v24, %v2537_v50  ;;  %v2539_v14 = vadd.f32 %v2538_v42, %v2381_v49 }
 0x289   : > { %v5524_v43 = vadd.f32 %v2689_v6, %v5504_v58 }
 0x28a   : > { %v2690_v44 = vrot.slane %v2655_v13, 1  ;;  %v2657_v19 = vadd.f32 %v2656_v22, %v2539_v14  ;;  %v2543_v35 = vpop.f32.mrf.mxu0 }
 0x28b   : > { %v2544_v53 = vadd.f32 %v2543_v35, %v2388_v39  ;;  %v5526_v17 = vpop.f32.mrf.mxu1 }
 0x28c   : > { %v2691_v37 = vsel %vm2683_vm4, %v2685_v12, %v2690_v44  ;;  %v2692_v11 = vrot.slane %v2657_v19, 1  ;;  %v2545_v33 = vpop.f32.mrf.mxu0 }
 0x28d   : > { %v5530_v28 = vadd.f32 %v2691_v37, %v5506_v51  ;;  %v2662_v2 = vadd.f32 %v2661_v52, %v2544_v53  ;;  %v2546_v27 = vadd.f32 %v2545_v33, %v2390_v62  ;;  %v3040_v7 = vpop.f32.mrf.mxu1 }
 0x28e   : > { %v2693_v49 = vsel %vm2683_vm4, %v2688_v20, %v2692_v11 }
 0x28f   : > { %v5534_v58 = vadd.f32 %v2693_v49, %v5508_v38  ;;  %v2694_v32 = vrot.slane %v2662_v2, 1  ;;  %v2664_v46 = vadd.f32 %v2663_v1, %v2546_v27  ;;  %v2550_v54 = vpop.f32.mrf.mxu0 }
 0x290   : > { %v2551_v39 = vadd.f32 %v2550_v54, %v2397_v15  ;;  %v3045_v57 = vpop.f32.mrf.mxu1 }
 0x291   : > { %v2695_v61 = vsel %vm2683_vm4, %v2690_v44, %v2694_v32  ;;  %v2696_v4 = vrot.slane %v2664_v46, 1  ;;  %v2552_v34 = vpop.f32.mrf.mxu0 }
 0x292   : > { %v5538_v51 = vadd.f32 %v2695_v61, %v5510_v60  ;;  %v2669_v63 = vadd.f32 %v2668_v3, %v2551_v39  ;;  %v2553_v62 = vadd.f32 %v2552_v34, %v2399_v31  ;;  %v3047_v10 = vpop.f32.mrf.mxu1 }
 0x293   : > { %v2697_v40 = vsel %vm2683_vm4, %v2692_v11, %v2696_v4 }
 0x294   : > { %v5542_v38 = vadd.f32 %v2697_v40, %v5512_v9  ;;  %v2698_v24 = vrot.slane %v2669_v63, 1  ;;  %v2671_v55 = vadd.f32 %v2670_v47, %v2553_v62 }
 0x295   : > { %v2832_v18 = vpop.f32.mrf.mxu0 }
 0x296   : > { %v2699_v15 = vsel %vm2683_vm4, %v2694_v32, %v2698_v24  ;;  %v2700_v22 = vrot.slane %v2671_v55, 1  ;;  %v3052_v56 = vpop.f32.mrf.mxu1  ;;  %v3039_v2 = vadd.f32 %v5526_v17, %v2832_v18 }
 0x297   : > { %v5546_v8 = vadd.f32 %v2699_v15, %v5514_v48  ;;  %v2834_v60 = vpop.f32.mrf.mxu0 }
 0x298   : > { %v2701_v52 = vsel %vm2683_vm4, %v2696_v4, %v2700_v22  ;;  %v3054_v31 = vpop.f32.mrf.mxu1  ;;  %v3041_v32 = vadd.f32 %v3040_v7, %v2834_v60 }
 0x299   : > { %5844 = vst [vmem:[#allocation8_spill] sm:$0xff] %v5546_v8  ;;  %v5550_v5 = vadd.f32 %v2701_v52, %v5516_v0 }
 0x29b   : > { %5845 = vst [vmem:[#allocation10_spill] sm:$0xff] %v5550_v5  ;;  %v2843_v21 = vpop.f32.mrf.mxu0  ;;  %v3059_v9 = vpop.f32.mrf.mxu1 }
 0x29c   : > { %v3046_v39 = vadd.f32 %v3045_v57, %v2843_v21 }
 0x29d   : > { %v2845_v29 = vpop.f32.mrf.mxu0  ;;  %v3061_v1 = vpop.f32.mrf.mxu1 }
 0x29e   : > { %v3048_v63 = vadd.f32 %v3047_v10, %v2845_v29 }
 0x2a1   : > { %v2854_v16 = vpop.f32.mrf.mxu0  ;;  %v5552_v36 = vpop.f32.mrf.mxu1 }
 0x2a2   : > { %v3053_v15 = vadd.f32 %v3052_v56, %v2854_v16 }
 0x2a3   : > { %v2856_v23 = vpop.f32.mrf.mxu0  ;;  %v5554_v25 = vpop.f32.mrf.mxu1 }
 0x2a4   : > { %v3055_v18 = vadd.f32 %v3054_v31, %v2856_v23 }
 0x2a6   : > { %v2865_v12 = vpop.f32.mrf.mxu0 }
 0x2a7   : > { %v3299_v48 = vpop.f32.mrf.mxu1  ;;  %v3060_v57 = vadd.f32 %v3059_v9, %v2865_v12 }
 0x2a8   : > { %v2867_v59 = vpop.f32.mrf.mxu0 }
 0x2a9   : > { %v3301_v45 = vpop.f32.mrf.mxu1 }
 0x2ab   : > { %v2876_v3 = vpop.f32.mrf.mxu0 }
 0x2ac   : > { %v3308_v41 = vpop.f32.mrf.mxu1  ;;  %v3067_v23 = vadd.f32 %v5552_v36, %v2876_v3 }
 0x2ad   : > { %v5556_v30 = vpop.f32.mrf.mxu0 }
 0x2ae   : > { %v3310_v0 = vpop.f32.mrf.mxu1 }
 0x2b1   : > { %v3175_v20 = vpop.f32.mrf.mxu0 }
 0x2b2   : > { %v3317_v50 = vpop.f32.mrf.mxu1  ;;  %v3176_v46 = vadd.f32 %v3175_v20, %v3039_v2  ;;  %v3062_v2 = vadd.f32 %v3061_v1, %v2867_v59  ;;  %v3069_v1 = vadd.f32 %v5554_v25, %v5556_v30 }
 0x2b3   : > { %v3177_v42 = vpop.f32.mrf.mxu0 }
 0x2b4   : > { %v3319_v47 = vpop.f32.mrf.mxu1  ;;  %v3178_v61 = vadd.f32 %v3177_v42, %v3041_v32  ;;  %v3300_v24 = vadd.f32 %v3299_v48, %v3176_v46 }
 0x2b6   : > { %v3302_v17 = vadd.f32 %v3301_v45, %v3178_v61 }
 0x2b7   : > { %v3183_v6 = vpop.f32.mrf.mxu0  ;;  %v5558_v13 = vpop.f32.mrf.mxu1 }
 0x2b8   : > { %v3184_v62 = vadd.f32 %v3183_v6, %v3046_v39 }
 0x2b9   : > { %v3185_v14 = vpop.f32.mrf.mxu0  ;;  %v5560_v44 = vpop.f32.mrf.mxu1 }
 0x2ba   : > { %v3186_v22 = vadd.f32 %v3185_v14, %v3048_v63  ;;  %v3309_v20 = vadd.f32 %v3308_v41, %v3184_v62 }
 0x2bc   : > { %v3311_v6 = vadd.f32 %v3310_v0, %v3186_v22 }
 0x2bd   : > { %v3191_v19 = vpop.f32.mrf.mxu0  ;;  %v5562_v35 = vpop.f32.mrf.mxu1 }
 0x2be   : > { %v3192_v7 = vadd.f32 %v3191_v19, %v3053_v15 }
 0x2bf   : > { %v3193_v53 = vpop.f32.mrf.mxu0  ;;  %v5564_v37 = vpop.f32.mrf.mxu1 }
 0x2c0   : > { %v3194_v21 = vadd.f32 %v3193_v53, %v3055_v18  ;;  %v3318_v31 = vadd.f32 %v3317_v50, %v3192_v7 }
 0x2c2   : > { %v3199_v11 = vpop.f32.mrf.mxu0  ;;  %v3320_v41 = vadd.f32 %v3319_v47, %v3194_v21 }
 0x2c3   : > { %v3579_v33 = vpop.f32.mrf.mxu1  ;;  %v3200_v56 = vadd.f32 %v3199_v11, %v3060_v57 }
 0x2c4   : > { %v3201_v27 = vpop.f32.mrf.mxu0 }
 0x2c5   : > { %v3581_v49 = vpop.f32.mrf.mxu1  ;;  %v3327_v50 = vadd.f32 %v5558_v13, %v3200_v56  ;;  %v5846_v56 = vld [vmem:[#allocation8_spill] sm:$0xff] }
 0x2c7   : > { %v3207_v54 = vpop.f32.mrf.mxu0 }
 0x2c8   : > { %v3586_v4 = vpop.f32.mrf.mxu1  ;;  %v3208_v59 = vadd.f32 %v3207_v54, %v3067_v23 }
 0x2c9   : > { %v3209_v34 = vpop.f32.mrf.mxu0 }
 0x2ca   : > { %v3588_v40 = vpop.f32.mrf.mxu1  ;;  %v3210_v39 = vadd.f32 %v3209_v34, %v3069_v1 }
 0x2cb   : > { %v3461_v55 = vpop.f32.mrf.mxu0 }
 0x2cc   : > { %v3462_v52 = vadd.f32 %v3461_v55, %v3300_v24  ;;  %v3593_v5 = vpop.f32.mrf.mxu1 }
 0x2cd   : > { %v3463_v8 = vpop.f32.mrf.mxu0 }
 0x2ce   : > { %v3464_v60 = vadd.f32 %v3463_v8, %v3302_v17  ;;  %v3595_v42 = vpop.f32.mrf.mxu1  ;;  %v3580_v29 = vadd.f32 %v3579_v33, %v3462_v52  ;;  %v3202_v8 = vadd.f32 %v3201_v27, %v3062_v2  ;;  %v3338_v52 = vadd.f32 %v5564_v37, %v3210_v39 }
 0x2cf   : > { %v3468_v10 = vpop.f32.mrf.mxu0 }
 0x2d0   : > { %v3469_v48 = vadd.f32 %v3468_v10, %v3309_v20  ;;  %v3582_v16 = vadd.f32 %v3581_v49, %v3464_v60  ;;  %v3600_v9 = vpop.f32.mrf.mxu1  ;;  %v3623_v19 = vrot.slane %v3580_v29, 2  ;;  %v3329_v63 = vadd.f32 %v5560_v44, %v3202_v8 }
 0x2d1   : > { %v3470_v14 = vpop.f32.mrf.mxu0 }
 0x2d2   : > { %v3587_v32 = vadd.f32 %v3586_v4, %v3469_v48  ;;  %v3471_v45 = vadd.f32 %v3470_v14, %v3311_v6  ;;  %v3626_v11 = vrot.slane %v3582_v16, 2  ;;  %v3602_v61 = vpop.f32.mrf.mxu1 }
 0x2d3   : > { %v3475_v12 = vpop.f32.mrf.mxu0 }
 0x2d4   : > { %v3624_v53 = vrot.slane %v3587_v32, 2  ;;  %v3589_v33 = vadd.f32 %v3588_v40, %v3471_v45  ;;  %v3476_v0 = vadd.f32 %v3475_v12, %v3318_v31  ;;  %v3607_v15 = vpop.f32.mrf.mxu1 }
 0x2d5   : > { %v3477_v49 = vpop.f32.mrf.mxu0 }
 0x2d6   : > { %v3625_v36 = vsel %vm3622_vm5, %v3623_v19, %v3624_v53  ;;  %v3627_v3 = vrot.slane %v3589_v33, 2  ;;  %v3594_v27 = vadd.f32 %v3593_v5, %v3476_v0  ;;  %v3478_v46 = vadd.f32 %v3477_v49, %v3320_v41  ;;  %v3609_v37 = vpop.f32.mrf.mxu1 }
 0x2d7   : > { %v3649_v47 = vadd.f32 %v3625_v36, %v5520_v26  ;;  %v3482_v4 = vpop.f32.mrf.mxu0  ;;  %v3336_v26 = vadd.f32 %v5562_v35, %v3208_v59 }
 0x2d8   : > { %v3628_v62 = vsel %vm3622_vm5, %v3626_v11, %v3627_v3  ;;  %v3629_v25 = vrot.slane %v3594_v27, 2  ;;  %v3596_v30 = vadd.f32 %v3595_v42, %v3478_v46  ;;  %v3483_v54 = vadd.f32 %v3482_v4, %v3327_v50 }
 0x2d9   : > { %3657 = vst [vmem:[%s5578_s8] sm:$0xff] %v3649_v47  ;;  %v3650_v5 = vadd.f32 %v3628_v62, %v5524_v43  ;;  %v3484_v13 = vpop.f32.mrf.mxu0 }
 0x2da   : > { %v3630_v34 = vsel %vm3622_vm5, %v3624_v53, %v3629_v25  ;;  %v3631_v40 = vrot.slane %v3596_v30, 2  ;;  %v3601_v44 = vadd.f32 %v3600_v9, %v3483_v54  ;;  %v3485_v24 = vadd.f32 %v3484_v13, %v3329_v63 }
 0x2db   : > { %3658 = vst [vmem:[%s5578_s8 + $0x8] sm:$0xff] %v3650_v5  ;;  %v3651_v55 = vadd.f32 %v3630_v34, %v5530_v28  ;;  %v3489_v22 = vpop.f32.mrf.mxu0 }
 0x2dc   : > { %v3632_v17 = vsel %vm3622_vm5, %v3627_v3, %v3631_v40  ;;  %v3633_v43 = vrot.slane %v3601_v44, 2  ;;  %v3603_v18 = vadd.f32 %v3602_v61, %v3485_v24  ;;  %v3490_v7 = vadd.f32 %v3489_v22, %v3336_v26 }
 0x2dd   : > { %3659 = vst [vmem:[%s5578_s8 + $0x10] sm:$0xff] %v3651_v55  ;;  %v3652_v35 = vadd.f32 %v3632_v17, %v5534_v58  ;;  %v3491_v60 = vpop.f32.mrf.mxu0 }
 0x2de   : > { %v3634_v20 = vsel %vm3622_vm5, %v3629_v25, %v3633_v43  ;;  %v3635_v28 = vrot.slane %v3603_v18, 2  ;;  %v3608_v57 = vadd.f32 %v3607_v15, %v3490_v7  ;;  %v3492_v21 = vadd.f32 %v3491_v60, %v3338_v52 }
 0x2df   : > { %3660 = vst [vmem:[%s5578_s8 + $0x18] sm:$0xff] %v3652_v35  ;;  %v3653_v42 = vadd.f32 %v3634_v20, %v5538_v51 }
 0x2e0   : > { %v3636_v10 = vsel %vm3622_vm5, %v3631_v40, %v3635_v28  ;;  %v3637_v29 = vrot.slane %v3608_v57, 2  ;;  %v3610_v48 = vadd.f32 %v3609_v37, %v3492_v21 }
 0x2e1   : > { %3661 = vst [vmem:[%s5578_s8 + $0x20] sm:$0xff] %v3653_v42  ;;  %v3654_v58 = vadd.f32 %v3636_v10, %v5542_v38  ;;  %v5847_v38 = vld [vmem:[#allocation10_spill] sm:$0xff] }
 0x2e2   : > { %v3638_v6 = vsel %vm3622_vm5, %v3633_v43, %v3637_v29  ;;  %v3639_v2 = vrot.slane %v3610_v48, 2 }
 0x2e3   : > { %3662 = vst [vmem:[%s5578_s8 + $0x28] sm:$0xff] %v3654_v58  ;;  %v3655_v16 = vadd.f32 %v3638_v6, %v5846_v56 }
 0x2e4   : > { %v3640_v51 = vsel %vm3622_vm5, %v3635_v28, %v3639_v2 }
 0x2e5   : > { %3663 = vst [vmem:[%s5578_s8 + $0x30] sm:$0xff] %v3655_v16  ;;  %v3656_v14 = vadd.f32 %v3640_v51, %v5847_v38 }
 0x2e7   : > { %3664 = vst [vmem:[%s5578_s8 + $0x38] sm:$0xff] %v3656_v14 }
 0x2e8   : > { %4067 = shalt.err (!%p4064_p3)
}
 0x2e9   : > { %s4068_s28 = scalar_lea.hbm %s5605_s19, 1024  ;;  %s4072_s4 = scalar_lea.hbm %s5662_s3, 2048 }
 0x2ea   : > { %p4069_p5 = scmp.ne.s32.totalorder %s5605_s19, %s4068_s28  ;;  %p4073_p9 = scmp.lt.s32.totalorder %s5605_s19, %s5662_s3 }
 0x2eb   : > { %p4074_p12 = scmp.lt.s32.totalorder %s4072_s4, %s4068_s28 }
 0x2ec   : > { %p4070_p6 = pnand %p4069_p5, %p4204_p4 }
 0x2ed   : > { %p4075_p10 = por %p4074_p12, %p4073_p9 }
 0x2ee   : > { %p4071_p7 = pneg %p4070_p6 }
 0x2f0   : > { %p4076_p11 = pnand %p4075_p10, %p4071_p7 }
 0x2f2   : > { %4079 = shalt.err (!%p4076_p11)
}
 0x2f3   : > { %s4142_s7 = smov 256   ;;  %s4143_s8 = smov 16  }
 0x2f4   : > { %3960 = dma.vmem_to_hbm [thread:$0]  (%p4204_p4), %s5607_s10, 1024, %s5605_s19, %s5614_s15, %s4142_s7, %s4142_s7, %s4143_s8  }
 0x2f5 PF: > { %p3972_p13 = scmp.ge.s32.totalorder %s4134_s17, 2  ;;  %s3697_s9 = sand.u32 1, %s4114_s12  }
 0x2f6   : > { %s3698_s11 = scalar_lea.sflag [#allocation4], %s3697_s9 }
 0x2f7   : > { %p3967_p0 = pnand %p3972_p13, %p4211_p8 }
 0x2f9   : > { %p3968_p1 = pneg %p3967_p0 }
 0x2fb   : > { %4109 = dma.done.wait (%p3968_p1), %s3698_s11, 1024  }
 0x2fc   : > { %4111 = vsyncadd (%p3968_p1), %s3698_s11, 4294966272  ;;  %s17_s17 = sadd.s32 1, %s4134_s17   ;;  %s5848_s12 = smov %s4118_s13 }
 0x2fd   : > { %p14_p2 = scmp.ge.s32.totalorder %s17_s17, 4   ;;  %s5849_s13 = smov %s4122_s14 }
 0x2fe   : > { %s5850_s14 = smov %s4217_s25  ;;  %s5851_s15 = smov %s4130_s16 }
 0x2ff   : > { %s5852_s16 = smov %s5854_s20  ;;  %16 = sbr.rel (!%p14_p2) target bundleno = 5 (0x5), region = 77 }
 0x304   :  { %3703 = vsyncpa [#allocation3], 1 }
 0x305   :  { %3705 = vsyncpa [#allocation3 + $0x1], 1 }
 0x306   :  { %3706 = vsyncpa [#allocation4], 1 }
 0x307   :  { %3708 = vsyncpa [#allocation4 + $0x1], 1 }

</bundles_post_ra>
